<compile_context>
chip_gen: v6e
topology: v6e:2x2x1
jax: 0.10.0
libtpu: 0.0.40
codegen_flags: <defaults>
</compile_context>

<pallas_src>
import functools

import jax
import jax.numpy as jnp
from jax import lax
from jax.experimental import pallas as pl
from jax.experimental.pallas import tpu as pltpu


def _layer_norm(v, gamma, beta, eps=1e-5):
    mu = jnp.mean(v, axis=-1, keepdims=True)
    var = jnp.mean((v - mu) ** 2, axis=-1, keepdims=True)
    return (v - mu) * lax.rsqrt(var + eps) * gamma + beta


def _block_kernel(x_ref, wq_ref, wk_ref, wv_ref, wp_ref, bp_ref,
                  g1_ref, be1_ref, g2_ref, be2_ref,
                  w1_ref, b1_ref, w2_ref, b2_ref,
                  o_ref,
                  h1_scr, k_scr, v_scr, att_scr,
                  *, num_heads):
    T, C = x_ref.shape                 # leading batch dim is Squeezed away
    TQ = o_ref.shape[0]                # query-block rows handled this step
    hs = C // num_heads
    bf16 = jnp.bfloat16
    neg_big = jnp.float32(-1e30)       # finite -> NaN-safe masking

    qi = pl.program_id(1)
    q_start = pl.multiple_of(qi * TQ, TQ)

    # --- once per batch element: full-sequence ln1 + K/V projections into
    #     persistent VMEM scratch (bf16). Reused by every query tile. ---
    @pl.when(qi == 0)
    def _():
        h1_full = _layer_norm(x_ref[...], g1_ref[...], be1_ref[...]).astype(bf16)
        h1_scr[...] = h1_full
        k_scr[...] = jnp.dot(h1_full, wk_ref[...],
                             preferred_element_type=jnp.float32).astype(bf16)
        v_scr[...] = jnp.dot(h1_full, wv_ref[...],
                             preferred_element_type=jnp.float32).astype(bf16)

    x_q = x_ref[pl.ds(q_start, TQ), :]           # (TQ, C) f32 residual input
    h1_q = h1_scr[pl.ds(q_start, TQ), :]         # (TQ, C) bf16, sliced (no recompute)

    # --- Q projection for this block (bf16 in, f32 MXU accumulation). ---
    q_all = jnp.dot(h1_q, wq_ref[...], preferred_element_type=jnp.float32)
    # Fold the attention scale into Q (reference uses C**-0.5, not hs**-0.5).
    q_bf = (q_all * (C ** -0.5)).astype(bf16)

    rows = q_start + lax.broadcasted_iota(jnp.int32, (TQ, TQ), 0)
    col_iota = lax.broadcasted_iota(jnp.int32, (TQ, TQ), 1)

    # Causal frontier: with TK == TQ, query block qi only needs KV chunks
    # 0..qi (chunk qi is the masked diagonal block).
    n_kv = qi + 1

    # --- attention: per-head online-softmax over KV chunks; each head's
    #     output goes into its slice of att_scr, projection done once after. ---
    for h in range(num_heads):                   # static (unrolled) head loop
        lo = h * hs
        q_h = q_bf[:, lo:lo + hs]                # (TQ, hs) bf16

        def kv_step(j, carry, lo=lo, q_h=q_h):
            m, l, acc = carry
            k_start = pl.multiple_of(j * TQ, TQ)
            k_h = k_scr[pl.ds(k_start, TQ), lo:lo + hs]      # (TQ, hs) bf16
            v_h = v_scr[pl.ds(k_start, TQ), lo:lo + hs]      # (TQ, hs) bf16
            # QK^T with no explicit transpose: contract the last dims.
            s = lax.dot_general(q_h, k_h, (((1,), (1,)), ((), ())),
                                preferred_element_type=jnp.float32)  # (TQ, TQ)
            s = jnp.where(rows >= k_start + col_iota, s, neg_big)
            m_new = jnp.maximum(m, jnp.max(s, axis=-1, keepdims=True))
            alpha = jnp.exp(m - m_new)
            p = jnp.exp(s - m_new)               # unnormalized probabilities
            # TODO(synk): attention-weight dropout skipped (inference identity).
            l_new = alpha * l + jnp.sum(p, axis=-1, keepdims=True)
            acc_new = alpha * acc + jnp.dot(p.astype(bf16), v_h,
                                            preferred_element_type=jnp.float32)
            return m_new, l_new, acc_new

        init = (jnp.full((TQ, 1), neg_big, jnp.float32),
                jnp.zeros((TQ, 1), jnp.float32),
                jnp.zeros((TQ, hs), jnp.float32))
        _, l_f, acc_f = lax.fori_loop(0, n_kv, kv_step, init)

        inv_l = pl.reciprocal(l_f, approx=True)
        att_scr[:, lo:lo + hs] = (acc_f * inv_l).astype(bf16)

    # Single wide output projection over the concatenated heads.
    sa = jnp.dot(att_scr[...], wp_ref[...], preferred_element_type=jnp.float32)
    x1 = x_q + sa + bp_ref[...]                  # residual 1

    # --- ln2 + feed-forward (bf16 matmuls, f32 elementwise) ---
    h2 = _layer_norm(x1, g2_ref[...], be2_ref[...])
    ff = jnp.dot(h2.astype(bf16), w1_ref[...],
                 preferred_element_type=jnp.float32) + b1_ref[...]
    ff = jnp.maximum(ff, 0.0)
    ff = jnp.dot(ff.astype(bf16), w2_ref[...],
                 preferred_element_type=jnp.float32) + b2_ref[...]
    # TODO(synk): ffwd dropout skipped (inference identity).

    o_ref[...] = (x1 + ff).astype(o_ref.dtype)   # residual 2


def transformer_block(x, params, *, q_block=None):
    """x: (B, T, C) float32; params: dict of weights (see init_params)."""
    B, T, C = x.shape
    H = params["wq"].shape[0]
    assert C % H == 0
    bf16 = jnp.bfloat16

    # Host-side fusion of per-head (H, C, hs) projection weights into
    # full-width (C, C) matrices (column block h == head h), cast to bf16 so
    # weights are half the VMEM/HBM footprint and never re-cast in-kernel.
    to_full = lambda w: jnp.transpose(w, (1, 0, 2)).reshape(C, C).astype(bf16)
    wq_full = to_full(params["wq"])
    wk_full = to_full(params["wk"])
    wv_full = to_full(params["wv"])
    wp_bf = params["w_proj"].astype(bf16)
    w1_bf = params["w1"].astype(bf16)
    w2_bf = params["w2"].astype(bf16)

    # Query-block size: must divide T and keep (8, 128)-friendly sublane rows.
    if q_block is None:
        q_block = min(T, 512)
    if T % q_block != 0 or (q_block != T and q_block % 8 != 0):
        q_block = T
    TQ = q_block
    NQ = T // TQ

    def const_spec(shape):
        # Weights/biases: constant index map, never re-fetched -> single buffer.
        return pl.BlockSpec(shape, lambda b, qi: (0,) * len(shape),
                            pipeline_mode=pl.Buffered(1))

    in_specs = [
        # Full sequence per batch element; index constant across qi so it is
        # DMA'd once per batch step. If VMEM-tight on v7x, drop to Buffered(1).
        pl.BlockSpec((pl.Squeezed(), T, C), lambda b, qi: (b, 0, 0)),
        const_spec((C, C)),            # wq (heads fused, bf16)
        const_spec((C, C)),            # wk (bf16)
        const_spec((C, C)),            # wv (bf16)
        const_spec((C, C)),            # w_proj (bf16)
        const_spec((1, C)),            # b_proj
        const_spec((1, C)),            # ln1 gamma
        const_spec((1, C)),            # ln1 beta
        const_spec((1, C)),            # ln2 gamma
        const_spec((1, C)),            # ln2 beta
        const_spec((C, 4 * C)),        # ffn w1 (bf16)
        const_spec((1, 4 * C)),        # ffn b1
        const_spec((4 * C, C)),        # ffn w2 (bf16)
        const_spec((1, C)),            # ffn b2
    ]
    out_spec = pl.BlockSpec((pl.Squeezed(), TQ, C), lambda b, qi: (b, qi, 0))

    scratch_shapes = [
        pltpu.VMEM((T, C), bf16),      # ln1(x) full sequence (per batch)
        pltpu.VMEM((T, C), bf16),      # K (per batch)
        pltpu.VMEM((T, C), bf16),      # V (per batch)
        pltpu.VMEM((TQ, C), bf16),     # per-head attention outputs (pre-proj)
    ]

    # Advisory cost estimate (K/V computed once per batch; causal ~halves attn).
    flops = int(2 * B * T * C * C * 12 + 2 * B * T * T * C)
    transcendentals = int(B * H * T * T // 2 + 4 * B * T)
    bytes_accessed = int(4 * 2 * B * T * C + 2 * 12 * C * C + 4 * 10 * C)

    return pl.pallas_call(
        functools.partial(_block_kernel, num_heads=H),
        out_shape=jax.ShapeDtypeStruct((B, T, C), x.dtype),
        grid_spec=pltpu.PrefetchScalarGridSpec(
            num_scalar_prefetch=0,
            grid=(B, NQ),
            in_specs=in_specs,
            out_specs=out_spec,
            scratch_shapes=scratch_shapes,
        ),
        compiler_params=pltpu.CompilerParams(
            # b parallel (megacore shards whole batch elements, keeps the
            # per-core K/V scratch reuse correct); qi must be sequential since
            # scratch written at qi==0 is read by later tiles.
            dimension_semantics=("parallel", "arbitrary"),
            # Stays under v7x's 64 MiB physical VMEM; fine on v5e/v6e too.
            vmem_limit_bytes=56 * 1024 * 1024,
        ),
        cost_estimate=pl.CostEstimate(flops=flops,
                                      transcendentals=transcendentals,
                                      bytes_accessed=bytes_accessed),
    )(x, wq_full, wk_full, wv_full,
      wp_bf, params["b_proj"],
      params["g1"], params["be1"], params["g2"], params["be2"],
      w1_bf, params["b1"], w2_bf, params["b2"])


def init_params(key, n_embed, n_heads):
    hs = n_embed // n_heads
    ks = jax.random.split(key, 9)

    def lin(k, fan_in, shape):
        bound = 1.0 / jnp.sqrt(fan_in)
        return jax.random.uniform(k, shape, jnp.float32, -bound, bound)

    return {
        "wq": lin(ks[0], n_embed, (n_heads, n_embed, hs)),
        "wk": lin(ks[1], n_embed, (n_heads, n_embed, hs)),
        "wv": lin(ks[2], n_embed, (n_heads, n_embed, hs)),
        "w_proj": lin(ks[3], n_embed, (n_embed, n_embed)),
        "b_proj": lin(ks[4], n_embed, (1, n_embed)),
        "g1": jnp.ones((1, n_embed), jnp.float32),
        "be1": jnp.zeros((1, n_embed), jnp.float32),
        "g2": jnp.ones((1, n_embed), jnp.float32),
        "be2": jnp.zeros((1, n_embed), jnp.float32),
        "w1": lin(ks[5], n_embed, (n_embed, 4 * n_embed)),
        "b1": lin(ks[6], n_embed, (1, 4 * n_embed)),
        "w2": lin(ks[7], 4 * n_embed, (4 * n_embed, n_embed)),
        "b2": lin(ks[8], 4 * n_embed, (1, n_embed)),
    }


def reference_block(x, params):
    """Pure-JAX f32 reference mirroring the PyTorch module (eval mode)."""
    B, T, C = x.shape
    H = params["wq"].shape[0]
    h1 = _layer_norm(x, params["g1"][0], params["be1"][0])
    causal = jnp.tril(jnp.ones((T, T), bool))
    outs = []
    for h in range(H):
        q = h1 @ params["wq"][h]
        k = h1 @ params["wk"][h]
        v = h1 @ params["wv"][h]
        wei = jnp.einsum("btd,bsd->bts", q, k) * C ** -0.5
        wei = jnp.where(causal[None], wei, -jnp.inf)
        wei = jax.nn.softmax(wei, axis=-1)
        outs.append(jnp.einsum("bts,bsd->btd", wei, v))
    sa = jnp.concatenate(outs, -1) @ params["w_proj"] + params["b_proj"][0]
    x1 = x + sa
    h2 = _layer_norm(x1, params["g2"][0], params["be2"][0])
    ff = jnp.maximum(h2 @ params["w1"] + params["b1"][0], 0.0)
    ff = ff @ params["w2"] + params["b2"][0]
    return x1 + ff


if __name__ == "__main__":
    B, T, C, H = 2, 16, 32, 4
    key = jax.random.PRNGKey(0)
    kx, kp = jax.random.split(key)
    x = jax.random.normal(kx, (B, T, C), jnp.float32)
    params = init_params(kp, C, H)

    # q_block=8 -> grid (B, 2): exercises the K/V-scratch reuse, the tiled
    # causal frontier (2 KV chunks on the second query tile) and offset masks.
    out = jax.block_until_ready(transformer_block(x, params, q_block=8))

    ref = reference_block(x, params)
    assert out.shape == (B, T, C)
    max_err = float(jnp.max(jnp.abs(out - ref)))
    # bf16 matmuls + approx reciprocal -> looser tolerance than a pure-f32 path.
    assert jnp.allclose(out, ref, atol=5e-2, rtol=5e-2), (
        f"mismatch vs reference (max abs err {max_err:.4e})")

    print("KERNEL_OK")
</pallas_src>

<mosaic_0001>
module attributes {stable_mosaic.version = 11 : i64} {
  func.func @_block_kernel(%arg0: i32, %arg1: i32, %arg2: memref<1x16x32xf32, #tpu.memory_space<vmem>>, %arg3: memref<32x32xbf16, #tpu.memory_space<vmem>>, %arg4: memref<32x32xbf16, #tpu.memory_space<vmem>>, %arg5: memref<32x32xbf16, #tpu.memory_space<vmem>>, %arg6: memref<32x32xbf16, #tpu.memory_space<vmem>>, %arg7: memref<1x32xf32, #tpu.memory_space<vmem>>, %arg8: memref<1x32xf32, #tpu.memory_space<vmem>>, %arg9: memref<1x32xf32, #tpu.memory_space<vmem>>, %arg10: memref<1x32xf32, #tpu.memory_space<vmem>>, %arg11: memref<1x32xf32, #tpu.memory_space<vmem>>, %arg12: memref<32x128xbf16, #tpu.memory_space<vmem>>, %arg13: memref<1x128xf32, #tpu.memory_space<vmem>>, %arg14: memref<128x32xbf16, #tpu.memory_space<vmem>>, %arg15: memref<1x32xf32, #tpu.memory_space<vmem>>, %arg16: memref<1x8x32xf32, #tpu.memory_space<vmem>>, %arg17: memref<16x32xbf16, #tpu.memory_space<vmem>>, %arg18: memref<16x32xbf16, #tpu.memory_space<vmem>>, %arg19: memref<16x32xbf16, #tpu.memory_space<vmem>>, %arg20: memref<8x32xbf16, #tpu.memory_space<vmem>>) attributes {dimension_semantics = [#tpu.dimension_semantics<parallel>, #tpu.dimension_semantics<arbitrary>], iteration_bounds = array<i64: 2, 2>, scalar_prefetch = 0 : i64, scratch_operands = 4 : i64, tpu.core_type = #tpu.core_type<tc>, window_params = [{transform_indices = @transform_0, window_bounds = array<i64: 1, 16, 32>}, {pipeline_mode = #tpu.pipeline_mode<synchronous>, transform_indices = @transform_1, window_bounds = array<i64: 32, 32>}, {pipeline_mode = #tpu.pipeline_mode<synchronous>, transform_indices = @transform_2, window_bounds = array<i64: 32, 32>}, {pipeline_mode = #tpu.pipeline_mode<synchronous>, transform_indices = @transform_3, window_bounds = array<i64: 32, 32>}, {pipeline_mode = #tpu.pipeline_mode<synchronous>, transform_indices = @transform_4, window_bounds = array<i64: 32, 32>}, {pipeline_mode = #tpu.pipeline_mode<synchronous>, transform_indices = @transform_5, window_bounds = array<i64: 1, 32>}, {pipeline_mode = #tpu.pipeline_mode<synchronous>, transform_indices = @transform_6, window_bounds = array<i64: 1, 32>}, {pipeline_mode = #tpu.pipeline_mode<synchronous>, transform_indices = @transform_7, window_bounds = array<i64: 1, 32>}, {pipeline_mode = #tpu.pipeline_mode<synchronous>, transform_indices = @transform_8, window_bounds = array<i64: 1, 32>}, {pipeline_mode = #tpu.pipeline_mode<synchronous>, transform_indices = @transform_9, window_bounds = array<i64: 1, 32>}, {pipeline_mode = #tpu.pipeline_mode<synchronous>, transform_indices = @transform_10, window_bounds = array<i64: 32, 128>}, {pipeline_mode = #tpu.pipeline_mode<synchronous>, transform_indices = @transform_11, window_bounds = array<i64: 1, 128>}, {pipeline_mode = #tpu.pipeline_mode<synchronous>, transform_indices = @transform_12, window_bounds = array<i64: 128, 32>}, {pipeline_mode = #tpu.pipeline_mode<synchronous>, transform_indices = @transform_13, window_bounds = array<i64: 1, 32>}, {transform_indices = @transform_14, window_bounds = array<i64: 1, 8, 32>}]} {
    %c8_i32 = arith.constant 8 : i32
    %0 = arith.muli %arg1, %c8_i32 : i32
    %1 = tpu.assume_multiple %0, 8 : i32
    %c0_i32 = arith.constant 0 : i32
    %2 = arith.cmpi eq, %arg1, %c0_i32 : i32
    %3 = arith.extui %2 : i1 to i32
    %c0_i32_0 = arith.constant 0 : i32
    %4 = arith.cmpi ne, %3, %c0_i32_0 : i32
    scf.if %4 {
      %c0_65 = arith.constant 0 : index
      %c0_66 = arith.constant 0 : index
      %c0_67 = arith.constant 0 : index
      %117 = vector.load %arg2[%c0_65, %c0_66, %c0_67] : memref<1x16x32xf32, #tpu.memory_space<vmem>>, vector<1x16x32xf32>
      %118 = vector.shape_cast %117 : vector<1x16x32xf32> to vector<16x32xf32>
      %c0_68 = arith.constant 0 : index
      %c0_69 = arith.constant 0 : index
      %119 = vector.load %arg8[%c0_68, %c0_69] : memref<1x32xf32, #tpu.memory_space<vmem>>, vector<1x32xf32>
      %c0_70 = arith.constant 0 : index
      %c0_71 = arith.constant 0 : index
      %120 = vector.load %arg9[%c0_70, %c0_71] : memref<1x32xf32, #tpu.memory_space<vmem>>, vector<1x32xf32>
      %cst_72 = arith.constant dense<0.000000e+00> : vector<16xf32>
      %121 = vector.multi_reduction <add>, %118, %cst_72 [1] : vector<16x32xf32> to vector<16xf32>
      %122 = vector.shape_cast %121 : vector<16xf32> to vector<16x1xf32>
      %cst_73 = arith.constant 3.200000e+01 : f32
      %123 = vector.broadcast %cst_73 : f32 to vector<16x1xf32>
      %124 = arith.divf %122, %123 : vector<16x1xf32>
      %125 = vector.broadcast %124 : vector<16x1xf32> to vector<16x32xf32>
      %126 = arith.subf %118, %125 : vector<16x32xf32>
      %127 = arith.mulf %126, %126 : vector<16x32xf32>
      %cst_74 = arith.constant dense<0.000000e+00> : vector<16xf32>
      %128 = vector.multi_reduction <add>, %127, %cst_74 [1] : vector<16x32xf32> to vector<16xf32>
      %129 = vector.shape_cast %128 : vector<16xf32> to vector<16x1xf32>
      %cst_75 = arith.constant 3.200000e+01 : f32
      %130 = vector.broadcast %cst_75 : f32 to vector<16x1xf32>
      %131 = arith.divf %129, %130 : vector<16x1xf32>
      %132 = vector.broadcast %124 : vector<16x1xf32> to vector<16x32xf32>
      %133 = arith.subf %118, %132 : vector<16x32xf32>
      %cst_76 = arith.constant 9.99999974E-6 : f32
      %134 = vector.broadcast %cst_76 : f32 to vector<16x1xf32>
      %135 = arith.addf %131, %134 : vector<16x1xf32>
      %136 = math.rsqrt %135 : vector<16x1xf32>
      %137 = vector.broadcast %136 : vector<16x1xf32> to vector<16x32xf32>
      %138 = arith.mulf %133, %137 : vector<16x32xf32>
      %139 = vector.broadcast %119 : vector<1x32xf32> to vector<16x32xf32>
      %140 = arith.mulf %138, %139 : vector<16x32xf32>
      %141 = vector.broadcast %120 : vector<1x32xf32> to vector<16x32xf32>
      %142 = arith.addf %140, %141 : vector<16x32xf32>
      %143 = arith.truncf %142 : vector<16x32xf32> to vector<16x32xbf16>
      %c0_77 = arith.constant 0 : index
      %c0_78 = arith.constant 0 : index
      %144 = vector.load %arg17[%c0_77, %c0_78] : memref<16x32xbf16, #tpu.memory_space<vmem>>, vector<16x32xbf16>
      tpu.vector_store %arg17[%c0_77, %c0_78], %143 {strides = array<i32>} : memref<16x32xbf16, #tpu.memory_space<vmem>>, vector<16x32xbf16>,
      %c0_79 = arith.constant 0 : index
      %c0_80 = arith.constant 0 : index
      %145 = vector.load %arg4[%c0_79, %c0_80] : memref<32x32xbf16, #tpu.memory_space<vmem>>, vector<32x32xbf16>
      %cst_81 = arith.constant dense<0.000000e+00> : vector<16x32xf32>
      %146 = tpu.matmul %143, %145, %cst_81 {dimension_numbers = #tpu.dot_dimension_numbers<[1], [0], [0], [1], [0, 0, 1, 1], [], []>} : vector<16x32xbf16>, vector<32x32xbf16>, vector<16x32xf32> -> vector<16x32xf32>
      %147 = arith.truncf %146 : vector<16x32xf32> to vector<16x32xbf16>
      %c0_82 = arith.constant 0 : index
      %c0_83 = arith.constant 0 : index
      %148 = vector.load %arg18[%c0_82, %c0_83] : memref<16x32xbf16, #tpu.memory_space<vmem>>, vector<16x32xbf16>
      tpu.vector_store %arg18[%c0_82, %c0_83], %147 {strides = array<i32>} : memref<16x32xbf16, #tpu.memory_space<vmem>>, vector<16x32xbf16>,
      %c0_84 = arith.constant 0 : index
      %c0_85 = arith.constant 0 : index
      %149 = vector.load %arg5[%c0_84, %c0_85] : memref<32x32xbf16, #tpu.memory_space<vmem>>, vector<32x32xbf16>
      %cst_86 = arith.constant dense<0.000000e+00> : vector<16x32xf32>
      %150 = tpu.matmul %143, %149, %cst_86 {dimension_numbers = #tpu.dot_dimension_numbers<[1], [0], [0], [1], [0, 0, 1, 1], [], []>} : vector<16x32xbf16>, vector<32x32xbf16>, vector<16x32xf32> -> vector<16x32xf32>
      %151 = arith.truncf %150 : vector<16x32xf32> to vector<16x32xbf16>
      %c0_87 = arith.constant 0 : index
      %c0_88 = arith.constant 0 : index
      %152 = vector.load %arg19[%c0_87, %c0_88] : memref<16x32xbf16, #tpu.memory_space<vmem>>, vector<16x32xbf16>
      tpu.vector_store %arg19[%c0_87, %c0_88], %151 {strides = array<i32>} : memref<16x32xbf16, #tpu.memory_space<vmem>>, vector<16x32xbf16>,
    } else {
    }
    %c0 = arith.constant 0 : index
    %5 = arith.index_cast %1 : i32 to index
    %c0_1 = arith.constant 0 : index
    %6 = vector.load %arg2[%c0, %5, %c0_1] : memref<1x16x32xf32, #tpu.memory_space<vmem>>, vector<1x8x32xf32>
    %7 = vector.shape_cast %6 : vector<1x8x32xf32> to vector<8x32xf32>
    %8 = arith.index_cast %1 : i32 to index
    %c0_2 = arith.constant 0 : index
    %9 = vector.load %arg17[%8, %c0_2] : memref<16x32xbf16, #tpu.memory_space<vmem>>, vector<8x32xbf16>
    %c0_3 = arith.constant 0 : index
    %c0_4 = arith.constant 0 : index
    %10 = vector.load %arg3[%c0_3, %c0_4] : memref<32x32xbf16, #tpu.memory_space<vmem>>, vector<32x32xbf16>
    %cst = arith.constant dense<0.000000e+00> : vector<8x32xf32>
    %11 = tpu.matmul %9, %10, %cst {dimension_numbers = #tpu.dot_dimension_numbers<[1], [0], [0], [1], [0, 0, 1, 1], [], []>} : vector<8x32xbf16>, vector<32x32xbf16>, vector<8x32xf32> -> vector<8x32xf32>
    %cst_5 = arith.constant 0.176776692 : f32
    %12 = vector.broadcast %cst_5 : f32 to vector<8x32xf32>
    %13 = arith.mulf %11, %12 : vector<8x32xf32>
    %14 = arith.truncf %13 : vector<8x32xf32> to vector<8x32xbf16>
    %15 = tpu.iota {dimensions = array<i32: 0>} : vector<8x8xi32>
    %16 = vector.broadcast %1 : i32 to vector<8x8xi32>
    %17 = arith.addi %16, %15 : vector<8x8xi32>
    %18 = tpu.iota {dimensions = array<i32: 1>} : vector<8x8xi32>
    %c1_i32 = arith.constant 1 : i32
    %19 = arith.addi %arg1, %c1_i32 : i32
    %20 = vector.extract_strided_slice %14 {offsets = [0, 0], sizes = [8, 8], strides = [1, 1]} : vector<8x32xbf16> to vector<8x8xbf16>
    %cst_6 = arith.constant -1.000000e+30 : f32
    %21 = vector.broadcast %cst_6 : f32 to vector<8x1xf32>
    %cst_7 = arith.constant 0.000000e+00 : f32
    %22 = vector.broadcast %cst_7 : f32 to vector<8x1xf32>
    %cst_8 = arith.constant 0.000000e+00 : f32
    %23 = vector.broadcast %cst_8 : f32 to vector<8x8xf32>
    %cst_9 = arith.constant -1.000000e+30 : f32
    %c0_i32_10 = arith.constant 0 : i32
    %24 = arith.subi %19, %c0_i32_10 : i32
    %25 = arith.addi %c0_i32_10, %24 : i32
    %c1_i32_11 = arith.constant 1 : i32
    %26:3 = scf.for %arg21 = %c0_i32_10 to %25 step %c1_i32_11 iter_args(%arg22 = %21, %arg23 = %22, %arg24 = %23) -> (vector<8x1xf32>, vector<8x1xf32>, vector<8x8xf32>)  : i32 {
      %c8_i32_65 = arith.constant 8 : i32
      %117 = arith.muli %arg21, %c8_i32_65 : i32
      %118 = tpu.assume_multiple %117, 8 : i32
      %119 = arith.index_cast %118 : i32 to index
      %c0_66 = arith.constant 0 : index
      %120 = vector.load %arg18[%119, %c0_66] : memref<16x32xbf16, #tpu.memory_space<vmem>>, vector<8x8xbf16>
      %121 = arith.index_cast %118 : i32 to index
      %c0_67 = arith.constant 0 : index
      %122 = vector.load %arg19[%121, %c0_67] : memref<16x32xbf16, #tpu.memory_space<vmem>>, vector<8x8xbf16>
      %cst_68 = arith.constant dense<0.000000e+00> : vector<8x8xf32>
      %123 = tpu.matmul %20, %120, %cst_68 {dimension_numbers = #tpu.dot_dimension_numbers<[1], [1], [0], [0], [0, 0, 1, 0], [], []>} : vector<8x8xbf16>, vector<8x8xbf16>, vector<8x8xf32> -> vector<8x8xf32>
      %124 = vector.broadcast %118 : i32 to vector<8x8xi32>
      %125 = arith.addi %124, %18 : vector<8x8xi32>
      %126 = arith.cmpi sge, %17, %125 : vector<8x8xi32>
      %127 = vector.broadcast %cst_9 : f32 to vector<8x8xf32>
      %128 = arith.select %126, %123, %127 : vector<8x8xi1>, vector<8x8xf32>
      %cst_69 = arith.constant dense<0xFF800000> : vector<8xf32>
      %129 = vector.multi_reduction <maximumf>, %128, %cst_69 [1] : vector<8x8xf32> to vector<8xf32>
      %130 = vector.shape_cast %129 : vector<8xf32> to vector<8x1xf32>
      %131 = arith.maximumf %arg22, %130 : vector<8x1xf32>
      %132 = arith.subf %arg22, %131 : vector<8x1xf32>
      %133 = math.exp %132 : vector<8x1xf32>
      %134 = vector.broadcast %131 : vector<8x1xf32> to vector<8x8xf32>
      %135 = arith.subf %128, %134 : vector<8x8xf32>
      %136 = math.exp %135 : vector<8x8xf32>
      %137 = arith.mulf %133, %arg23 : vector<8x1xf32>
      %cst_70 = arith.constant dense<0.000000e+00> : vector<8xf32>
      %138 = vector.multi_reduction <add>, %136, %cst_70 [1] : vector<8x8xf32> to vector<8xf32>
      %139 = vector.shape_cast %138 : vector<8xf32> to vector<8x1xf32>
      %140 = arith.addf %137, %139 : vector<8x1xf32>
      %141 = vector.broadcast %133 : vector<8x1xf32> to vector<8x8xf32>
      %142 = arith.mulf %141, %arg24 : vector<8x8xf32>
      %143 = arith.truncf %136 : vector<8x8xf32> to vector<8x8xbf16>
      %cst_71 = arith.constant dense<0.000000e+00> : vector<8x8xf32>
      %144 = tpu.matmul %143, %122, %cst_71 {dimension_numbers = #tpu.dot_dimension_numbers<[1], [0], [0], [1], [0, 0, 1, 1], [], []>} : vector<8x8xbf16>, vector<8x8xbf16>, vector<8x8xf32> -> vector<8x8xf32>
      %145 = arith.addf %142, %144 : vector<8x8xf32>
      scf.yield %131, %140, %145 : vector<8x1xf32>, vector<8x1xf32>, vector<8x8xf32>
    }
    %27 = tpu.reciprocal %26#1 {approx = true} : vector<8x1xf32> -> vector<8x1xf32>
    %28 = vector.broadcast %27 : vector<8x1xf32> to vector<8x8xf32>
    %29 = arith.mulf %26#2, %28 : vector<8x8xf32>
    %30 = arith.truncf %29 : vector<8x8xf32> to vector<8x8xbf16>
    %c0_12 = arith.constant 0 : index
    %c0_13 = arith.constant 0 : index
    %31 = vector.load %arg20[%c0_12, %c0_13] : memref<8x32xbf16, #tpu.memory_space<vmem>>, vector<8x8xbf16>
    tpu.vector_store %arg20[%c0_12, %c0_13], %30 {strides = array<i32>} : memref<8x32xbf16, #tpu.memory_space<vmem>>, vector<8x8xbf16>,
    %32 = vector.extract_strided_slice %14 {offsets = [0, 8], sizes = [8, 8], strides = [1, 1]} : vector<8x32xbf16> to vector<8x8xbf16>
    %cst_14 = arith.constant -1.000000e+30 : f32
    %33 = vector.broadcast %cst_14 : f32 to vector<8x1xf32>
    %cst_15 = arith.constant 0.000000e+00 : f32
    %34 = vector.broadcast %cst_15 : f32 to vector<8x1xf32>
    %cst_16 = arith.constant 0.000000e+00 : f32
    %35 = vector.broadcast %cst_16 : f32 to vector<8x8xf32>
    %cst_17 = arith.constant -1.000000e+30 : f32
    %c0_i32_18 = arith.constant 0 : i32
    %36 = arith.subi %19, %c0_i32_18 : i32
    %37 = arith.addi %c0_i32_18, %36 : i32
    %c1_i32_19 = arith.constant 1 : i32
    %38:3 = scf.for %arg21 = %c0_i32_18 to %37 step %c1_i32_19 iter_args(%arg22 = %33, %arg23 = %34, %arg24 = %35) -> (vector<8x1xf32>, vector<8x1xf32>, vector<8x8xf32>)  : i32 {
      %c8_i32_65 = arith.constant 8 : i32
      %117 = arith.muli %arg21, %c8_i32_65 : i32
      %118 = tpu.assume_multiple %117, 8 : i32
      %119 = arith.index_cast %118 : i32 to index
      %c8_66 = arith.constant 8 : index
      %120 = vector.load %arg18[%119, %c8_66] : memref<16x32xbf16, #tpu.memory_space<vmem>>, vector<8x8xbf16>
      %121 = arith.index_cast %118 : i32 to index
      %c8_67 = arith.constant 8 : index
      %122 = vector.load %arg19[%121, %c8_67] : memref<16x32xbf16, #tpu.memory_space<vmem>>, vector<8x8xbf16>
      %cst_68 = arith.constant dense<0.000000e+00> : vector<8x8xf32>
      %123 = tpu.matmul %32, %120, %cst_68 {dimension_numbers = #tpu.dot_dimension_numbers<[1], [1], [0], [0], [0, 0, 1, 0], [], []>} : vector<8x8xbf16>, vector<8x8xbf16>, vector<8x8xf32> -> vector<8x8xf32>
      %124 = vector.broadcast %118 : i32 to vector<8x8xi32>
      %125 = arith.addi %124, %18 : vector<8x8xi32>
      %126 = arith.cmpi sge, %17, %125 : vector<8x8xi32>
      %127 = vector.broadcast %cst_17 : f32 to vector<8x8xf32>
      %128 = arith.select %126, %123, %127 : vector<8x8xi1>, vector<8x8xf32>
      %cst_69 = arith.constant dense<0xFF800000> : vector<8xf32>
      %129 = vector.multi_reduction <maximumf>, %128, %cst_69 [1] : vector<8x8xf32> to vector<8xf32>
      %130 = vector.shape_cast %129 : vector<8xf32> to vector<8x1xf32>
      %131 = arith.maximumf %arg22, %130 : vector<8x1xf32>
      %132 = arith.subf %arg22, %131 : vector<8x1xf32>
      %133 = math.exp %132 : vector<8x1xf32>
      %134 = vector.broadcast %131 : vector<8x1xf32> to vector<8x8xf32>
      %135 = arith.subf %128, %134 : vector<8x8xf32>
      %136 = math.exp %135 : vector<8x8xf32>
      %137 = arith.mulf %133, %arg23 : vector<8x1xf32>
      %cst_70 = arith.constant dense<0.000000e+00> : vector<8xf32>
      %138 = vector.multi_reduction <add>, %136, %cst_70 [1] : vector<8x8xf32> to vector<8xf32>
      %139 = vector.shape_cast %138 : vector<8xf32> to vector<8x1xf32>
      %140 = arith.addf %137, %139 : vector<8x1xf32>
      %141 = vector.broadcast %133 : vector<8x1xf32> to vector<8x8xf32>
      %142 = arith.mulf %141, %arg24 : vector<8x8xf32>
      %143 = arith.truncf %136 : vector<8x8xf32> to vector<8x8xbf16>
      %cst_71 = arith.constant dense<0.000000e+00> : vector<8x8xf32>
      %144 = tpu.matmul %143, %122, %cst_71 {dimension_numbers = #tpu.dot_dimension_numbers<[1], [0], [0], [1], [0, 0, 1, 1], [], []>} : vector<8x8xbf16>, vector<8x8xbf16>, vector<8x8xf32> -> vector<8x8xf32>
      %145 = arith.addf %142, %144 : vector<8x8xf32>
      scf.yield %131, %140, %145 : vector<8x1xf32>, vector<8x1xf32>, vector<8x8xf32>
    }
    %39 = tpu.reciprocal %38#1 {approx = true} : vector<8x1xf32> -> vector<8x1xf32>
    %40 = vector.broadcast %39 : vector<8x1xf32> to vector<8x8xf32>
    %41 = arith.mulf %38#2, %40 : vector<8x8xf32>
    %42 = arith.truncf %41 : vector<8x8xf32> to vector<8x8xbf16>
    %c0_20 = arith.constant 0 : index
    %c8 = arith.constant 8 : index
    %43 = vector.load %arg20[%c0_20, %c8] : memref<8x32xbf16, #tpu.memory_space<vmem>>, vector<8x8xbf16>
    tpu.vector_store %arg20[%c0_20, %c8], %42 {strides = array<i32>} : memref<8x32xbf16, #tpu.memory_space<vmem>>, vector<8x8xbf16>,
    %44 = vector.extract_strided_slice %14 {offsets = [0, 16], sizes = [8, 8], strides = [1, 1]} : vector<8x32xbf16> to vector<8x8xbf16>
    %cst_21 = arith.constant -1.000000e+30 : f32
    %45 = vector.broadcast %cst_21 : f32 to vector<8x1xf32>
    %cst_22 = arith.constant 0.000000e+00 : f32
    %46 = vector.broadcast %cst_22 : f32 to vector<8x1xf32>
    %cst_23 = arith.constant 0.000000e+00 : f32
    %47 = vector.broadcast %cst_23 : f32 to vector<8x8xf32>
    %cst_24 = arith.constant -1.000000e+30 : f32
    %c0_i32_25 = arith.constant 0 : i32
    %48 = arith.subi %19, %c0_i32_25 : i32
    %49 = arith.addi %c0_i32_25, %48 : i32
    %c1_i32_26 = arith.constant 1 : i32
    %50:3 = scf.for %arg21 = %c0_i32_25 to %49 step %c1_i32_26 iter_args(%arg22 = %45, %arg23 = %46, %arg24 = %47) -> (vector<8x1xf32>, vector<8x1xf32>, vector<8x8xf32>)  : i32 {
      %c8_i32_65 = arith.constant 8 : i32
      %117 = arith.muli %arg21, %c8_i32_65 : i32
      %118 = tpu.assume_multiple %117, 8 : i32
      %119 = arith.index_cast %118 : i32 to index
      %c16_66 = arith.constant 16 : index
      %120 = vector.load %arg18[%119, %c16_66] : memref<16x32xbf16, #tpu.memory_space<vmem>>, vector<8x8xbf16>
      %121 = arith.index_cast %118 : i32 to index
      %c16_67 = arith.constant 16 : index
      %122 = vector.load %arg19[%121, %c16_67] : memref<16x32xbf16, #tpu.memory_space<vmem>>, vector<8x8xbf16>
      %cst_68 = arith.constant dense<0.000000e+00> : vector<8x8xf32>
      %123 = tpu.matmul %44, %120, %cst_68 {dimension_numbers = #tpu.dot_dimension_numbers<[1], [1], [0], [0], [0, 0, 1, 0], [], []>} : vector<8x8xbf16>, vector<8x8xbf16>, vector<8x8xf32> -> vector<8x8xf32>
      %124 = vector.broadcast %118 : i32 to vector<8x8xi32>
      %125 = arith.addi %124, %18 : vector<8x8xi32>
      %126 = arith.cmpi sge, %17, %125 : vector<8x8xi32>
      %127 = vector.broadcast %cst_24 : f32 to vector<8x8xf32>
      %128 = arith.select %126, %123, %127 : vector<8x8xi1>, vector<8x8xf32>
      %cst_69 = arith.constant dense<0xFF800000> : vector<8xf32>
      %129 = vector.multi_reduction <maximumf>, %128, %cst_69 [1] : vector<8x8xf32> to vector<8xf32>
      %130 = vector.shape_cast %129 : vector<8xf32> to vector<8x1xf32>
      %131 = arith.maximumf %arg22, %130 : vector<8x1xf32>
      %132 = arith.subf %arg22, %131 : vector<8x1xf32>
      %133 = math.exp %132 : vector<8x1xf32>
      %134 = vector.broadcast %131 : vector<8x1xf32> to vector<8x8xf32>
      %135 = arith.subf %128, %134 : vector<8x8xf32>
      %136 = math.exp %135 : vector<8x8xf32>
      %137 = arith.mulf %133, %arg23 : vector<8x1xf32>
      %cst_70 = arith.constant dense<0.000000e+00> : vector<8xf32>
      %138 = vector.multi_reduction <add>, %136, %cst_70 [1] : vector<8x8xf32> to vector<8xf32>
      %139 = vector.shape_cast %138 : vector<8xf32> to vector<8x1xf32>
      %140 = arith.addf %137, %139 : vector<8x1xf32>
      %141 = vector.broadcast %133 : vector<8x1xf32> to vector<8x8xf32>
      %142 = arith.mulf %141, %arg24 : vector<8x8xf32>
      %143 = arith.truncf %136 : vector<8x8xf32> to vector<8x8xbf16>
      %cst_71 = arith.constant dense<0.000000e+00> : vector<8x8xf32>
      %144 = tpu.matmul %143, %122, %cst_71 {dimension_numbers = #tpu.dot_dimension_numbers<[1], [0], [0], [1], [0, 0, 1, 1], [], []>} : vector<8x8xbf16>, vector<8x8xbf16>, vector<8x8xf32> -> vector<8x8xf32>
      %145 = arith.addf %142, %144 : vector<8x8xf32>
      scf.yield %131, %140, %145 : vector<8x1xf32>, vector<8x1xf32>, vector<8x8xf32>
    }
    %51 = tpu.reciprocal %50#1 {approx = true} : vector<8x1xf32> -> vector<8x1xf32>
    %52 = vector.broadcast %51 : vector<8x1xf32> to vector<8x8xf32>
    %53 = arith.mulf %50#2, %52 : vector<8x8xf32>
    %54 = arith.truncf %53 : vector<8x8xf32> to vector<8x8xbf16>
    %c0_27 = arith.constant 0 : index
    %c16 = arith.constant 16 : index
    %55 = vector.load %arg20[%c0_27, %c16] : memref<8x32xbf16, #tpu.memory_space<vmem>>, vector<8x8xbf16>
    tpu.vector_store %arg20[%c0_27, %c16], %54 {strides = array<i32>} : memref<8x32xbf16, #tpu.memory_space<vmem>>, vector<8x8xbf16>,
    %56 = vector.extract_strided_slice %14 {offsets = [0, 24], sizes = [8, 8], strides = [1, 1]} : vector<8x32xbf16> to vector<8x8xbf16>
    %cst_28 = arith.constant -1.000000e+30 : f32
    %57 = vector.broadcast %cst_28 : f32 to vector<8x1xf32>
    %cst_29 = arith.constant 0.000000e+00 : f32
    %58 = vector.broadcast %cst_29 : f32 to vector<8x1xf32>
    %cst_30 = arith.constant 0.000000e+00 : f32
    %59 = vector.broadcast %cst_30 : f32 to vector<8x8xf32>
    %cst_31 = arith.constant -1.000000e+30 : f32
    %c0_i32_32 = arith.constant 0 : i32
    %60 = arith.subi %19, %c0_i32_32 : i32
    %61 = arith.addi %c0_i32_32, %60 : i32
    %c1_i32_33 = arith.constant 1 : i32
    %62:3 = scf.for %arg21 = %c0_i32_32 to %61 step %c1_i32_33 iter_args(%arg22 = %57, %arg23 = %58, %arg24 = %59) -> (vector<8x1xf32>, vector<8x1xf32>, vector<8x8xf32>)  : i32 {
      %c8_i32_65 = arith.constant 8 : i32
      %117 = arith.muli %arg21, %c8_i32_65 : i32
      %118 = tpu.assume_multiple %117, 8 : i32
      %119 = arith.index_cast %118 : i32 to index
      %c24_66 = arith.constant 24 : index
      %120 = vector.load %arg18[%119, %c24_66] : memref<16x32xbf16, #tpu.memory_space<vmem>>, vector<8x8xbf16>
      %121 = arith.index_cast %118 : i32 to index
      %c24_67 = arith.constant 24 : index
      %122 = vector.load %arg19[%121, %c24_67] : memref<16x32xbf16, #tpu.memory_space<vmem>>, vector<8x8xbf16>
      %cst_68 = arith.constant dense<0.000000e+00> : vector<8x8xf32>
      %123 = tpu.matmul %56, %120, %cst_68 {dimension_numbers = #tpu.dot_dimension_numbers<[1], [1], [0], [0], [0, 0, 1, 0], [], []>} : vector<8x8xbf16>, vector<8x8xbf16>, vector<8x8xf32> -> vector<8x8xf32>
      %124 = vector.broadcast %118 : i32 to vector<8x8xi32>
      %125 = arith.addi %124, %18 : vector<8x8xi32>
      %126 = arith.cmpi sge, %17, %125 : vector<8x8xi32>
      %127 = vector.broadcast %cst_31 : f32 to vector<8x8xf32>
      %128 = arith.select %126, %123, %127 : vector<8x8xi1>, vector<8x8xf32>
      %cst_69 = arith.constant dense<0xFF800000> : vector<8xf32>
      %129 = vector.multi_reduction <maximumf>, %128, %cst_69 [1] : vector<8x8xf32> to vector<8xf32>
      %130 = vector.shape_cast %129 : vector<8xf32> to vector<8x1xf32>
      %131 = arith.maximumf %arg22, %130 : vector<8x1xf32>
      %132 = arith.subf %arg22, %131 : vector<8x1xf32>
      %133 = math.exp %132 : vector<8x1xf32>
      %134 = vector.broadcast %131 : vector<8x1xf32> to vector<8x8xf32>
      %135 = arith.subf %128, %134 : vector<8x8xf32>
      %136 = math.exp %135 : vector<8x8xf32>
      %137 = arith.mulf %133, %arg23 : vector<8x1xf32>
      %cst_70 = arith.constant dense<0.000000e+00> : vector<8xf32>
      %138 = vector.multi_reduction <add>, %136, %cst_70 [1] : vector<8x8xf32> to vector<8xf32>
      %139 = vector.shape_cast %138 : vector<8xf32> to vector<8x1xf32>
      %140 = arith.addf %137, %139 : vector<8x1xf32>
      %141 = vector.broadcast %133 : vector<8x1xf32> to vector<8x8xf32>
      %142 = arith.mulf %141, %arg24 : vector<8x8xf32>
      %143 = arith.truncf %136 : vector<8x8xf32> to vector<8x8xbf16>
      %cst_71 = arith.constant dense<0.000000e+00> : vector<8x8xf32>
      %144 = tpu.matmul %143, %122, %cst_71 {dimension_numbers = #tpu.dot_dimension_numbers<[1], [0], [0], [1], [0, 0, 1, 1], [], []>} : vector<8x8xbf16>, vector<8x8xbf16>, vector<8x8xf32> -> vector<8x8xf32>
      %145 = arith.addf %142, %144 : vector<8x8xf32>
      scf.yield %131, %140, %145 : vector<8x1xf32>, vector<8x1xf32>, vector<8x8xf32>
    }
    %63 = tpu.reciprocal %62#1 {approx = true} : vector<8x1xf32> -> vector<8x1xf32>
    %64 = vector.broadcast %63 : vector<8x1xf32> to vector<8x8xf32>
    %65 = arith.mulf %62#2, %64 : vector<8x8xf32>
    %66 = arith.truncf %65 : vector<8x8xf32> to vector<8x8xbf16>
    %c0_34 = arith.constant 0 : index
    %c24 = arith.constant 24 : index
    %67 = vector.load %arg20[%c0_34, %c24] : memref<8x32xbf16, #tpu.memory_space<vmem>>, vector<8x8xbf16>
    tpu.vector_store %arg20[%c0_34, %c24], %66 {strides = array<i32>} : memref<8x32xbf16, #tpu.memory_space<vmem>>, vector<8x8xbf16>,
    %c0_35 = arith.constant 0 : index
    %c0_36 = arith.constant 0 : index
    %68 = vector.load %arg20[%c0_35, %c0_36] : memref<8x32xbf16, #tpu.memory_space<vmem>>, vector<8x32xbf16>
    %c0_37 = arith.constant 0 : index
    %c0_38 = arith.constant 0 : index
    %69 = vector.load %arg6[%c0_37, %c0_38] : memref<32x32xbf16, #tpu.memory_space<vmem>>, vector<32x32xbf16>
    %cst_39 = arith.constant dense<0.000000e+00> : vector<8x32xf32>
    %70 = tpu.matmul %68, %69, %cst_39 {dimension_numbers = #tpu.dot_dimension_numbers<[1], [0], [0], [1], [0, 0, 1, 1], [], []>} : vector<8x32xbf16>, vector<32x32xbf16>, vector<8x32xf32> -> vector<8x32xf32>
    %71 = arith.addf %7, %70 : vector<8x32xf32>
    %c0_40 = arith.constant 0 : index
    %c0_41 = arith.constant 0 : index
    %72 = vector.load %arg7[%c0_40, %c0_41] : memref<1x32xf32, #tpu.memory_space<vmem>>, vector<1x32xf32>
    %73 = vector.broadcast %72 : vector<1x32xf32> to vector<8x32xf32>
    %74 = arith.addf %71, %73 : vector<8x32xf32>
    %c0_42 = arith.constant 0 : index
    %c0_43 = arith.constant 0 : index
    %75 = vector.load %arg10[%c0_42, %c0_43] : memref<1x32xf32, #tpu.memory_space<vmem>>, vector<1x32xf32>
    %c0_44 = arith.constant 0 : index
    %c0_45 = arith.constant 0 : index
    %76 = vector.load %arg11[%c0_44, %c0_45] : memref<1x32xf32, #tpu.memory_space<vmem>>, vector<1x32xf32>
    %cst_46 = arith.constant dense<0.000000e+00> : vector<8xf32>
    %77 = vector.multi_reduction <add>, %74, %cst_46 [1] : vector<8x32xf32> to vector<8xf32>
    %78 = vector.shape_cast %77 : vector<8xf32> to vector<8x1xf32>
    %cst_47 = arith.constant 3.200000e+01 : f32
    %79 = vector.broadcast %cst_47 : f32 to vector<8x1xf32>
    %80 = arith.divf %78, %79 : vector<8x1xf32>
    %81 = vector.broadcast %80 : vector<8x1xf32> to vector<8x32xf32>
    %82 = arith.subf %74, %81 : vector<8x32xf32>
    %83 = arith.mulf %82, %82 : vector<8x32xf32>
    %cst_48 = arith.constant dense<0.000000e+00> : vector<8xf32>
    %84 = vector.multi_reduction <add>, %83, %cst_48 [1] : vector<8x32xf32> to vector<8xf32>
    %85 = vector.shape_cast %84 : vector<8xf32> to vector<8x1xf32>
    %cst_49 = arith.constant 3.200000e+01 : f32
    %86 = vector.broadcast %cst_49 : f32 to vector<8x1xf32>
    %87 = arith.divf %85, %86 : vector<8x1xf32>
    %88 = vector.broadcast %80 : vector<8x1xf32> to vector<8x32xf32>
    %89 = arith.subf %74, %88 : vector<8x32xf32>
    %cst_50 = arith.constant 9.99999974E-6 : f32
    %90 = vector.broadcast %cst_50 : f32 to vector<8x1xf32>
    %91 = arith.addf %87, %90 : vector<8x1xf32>
    %92 = math.rsqrt %91 : vector<8x1xf32>
    %93 = vector.broadcast %92 : vector<8x1xf32> to vector<8x32xf32>
    %94 = arith.mulf %89, %93 : vector<8x32xf32>
    %95 = vector.broadcast %75 : vector<1x32xf32> to vector<8x32xf32>
    %96 = arith.mulf %94, %95 : vector<8x32xf32>
    %97 = vector.broadcast %76 : vector<1x32xf32> to vector<8x32xf32>
    %98 = arith.addf %96, %97 : vector<8x32xf32>
    %99 = arith.truncf %98 : vector<8x32xf32> to vector<8x32xbf16>
    %c0_51 = arith.constant 0 : index
    %c0_52 = arith.constant 0 : index
    %100 = vector.load %arg12[%c0_51, %c0_52] : memref<32x128xbf16, #tpu.memory_space<vmem>>, vector<32x128xbf16>
    %cst_53 = arith.constant dense<0.000000e+00> : vector<8x128xf32>
    %101 = tpu.matmul %99, %100, %cst_53 {dimension_numbers = #tpu.dot_dimension_numbers<[1], [0], [0], [1], [0, 0, 1, 1], [], []>} : vector<8x32xbf16>, vector<32x128xbf16>, vector<8x128xf32> -> vector<8x128xf32>
    %c0_54 = arith.constant 0 : index
    %c0_55 = arith.constant 0 : index
    %102 = vector.load %arg13[%c0_54, %c0_55] : memref<1x128xf32, #tpu.memory_space<vmem>>, vector<1x128xf32>
    %103 = vector.broadcast %102 : vector<1x128xf32> to vector<8x128xf32>
    %104 = arith.addf %101, %103 : vector<8x128xf32>
    %cst_56 = arith.constant 0.000000e+00 : f32
    %105 = vector.broadcast %cst_56 : f32 to vector<8x128xf32>
    %106 = arith.maximumf %104, %105 : vector<8x128xf32>
    %107 = arith.truncf %106 : vector<8x128xf32> to vector<8x128xbf16>
    %c0_57 = arith.constant 0 : index
    %c0_58 = arith.constant 0 : index
    %108 = vector.load %arg14[%c0_57, %c0_58] : memref<128x32xbf16, #tpu.memory_space<vmem>>, vector<128x32xbf16>
    %cst_59 = arith.constant dense<0.000000e+00> : vector<8x32xf32>
    %109 = tpu.matmul %107, %108, %cst_59 {dimension_numbers = #tpu.dot_dimension_numbers<[1], [0], [0], [1], [0, 0, 1, 1], [], []>} : vector<8x128xbf16>, vector<128x32xbf16>, vector<8x32xf32> -> vector<8x32xf32>
    %c0_60 = arith.constant 0 : index
    %c0_61 = arith.constant 0 : index
    %110 = vector.load %arg15[%c0_60, %c0_61] : memref<1x32xf32, #tpu.memory_space<vmem>>, vector<1x32xf32>
    %111 = vector.broadcast %110 : vector<1x32xf32> to vector<8x32xf32>
    %112 = arith.addf %109, %111 : vector<8x32xf32>
    %113 = arith.addf %74, %112 : vector<8x32xf32>
    %c0_62 = arith.constant 0 : index
    %c0_63 = arith.constant 0 : index
    %c0_64 = arith.constant 0 : index
    %114 = vector.load %arg16[%c0_62, %c0_63, %c0_64] : memref<1x8x32xf32, #tpu.memory_space<vmem>>, vector<1x8x32xf32>
    %115 = vector.shape_cast %114 : vector<1x8x32xf32> to vector<8x32xf32>
    %116 = vector.shape_cast %113 : vector<8x32xf32> to vector<1x8x32xf32>
    tpu.vector_store %arg16[%c0_62, %c0_63, %c0_64], %116 {strides = array<i32>} : memref<1x8x32xf32, #tpu.memory_space<vmem>>, vector<1x8x32xf32>,
    return
  }
  func.func @transform_0(%arg0: i32, %arg1: i32) -> (i32, i32, i32) {
    %c0_i32 = arith.constant 0 : i32
    %c0_i32_0 = arith.constant 0 : i32
    %c0_i32_1 = arith.constant 0 : i32
    return %arg0, %c0_i32, %c0_i32_0 : i32, i32, i32
  }
  func.func @transform_1(%arg0: i32, %arg1: i32) -> (i32, i32) {
    %c0_i32 = arith.constant 0 : i32
    %c0_i32_0 = arith.constant 0 : i32
    %c0_i32_1 = arith.constant 0 : i32
    return %c0_i32, %c0_i32_0 : i32, i32
  }
  func.func @transform_2(%arg0: i32, %arg1: i32) -> (i32, i32) {
    %c0_i32 = arith.constant 0 : i32
    %c0_i32_0 = arith.constant 0 : i32
    %c0_i32_1 = arith.constant 0 : i32
    return %c0_i32, %c0_i32_0 : i32, i32
  }
  func.func @transform_3(%arg0: i32, %arg1: i32) -> (i32, i32) {
    %c0_i32 = arith.constant 0 : i32
    %c0_i32_0 = arith.constant 0 : i32
    %c0_i32_1 = arith.constant 0 : i32
    return %c0_i32, %c0_i32_0 : i32, i32
  }
  func.func @transform_4(%arg0: i32, %arg1: i32) -> (i32, i32) {
    %c0_i32 = arith.constant 0 : i32
    %c0_i32_0 = arith.constant 0 : i32
    %c0_i32_1 = arith.constant 0 : i32
    return %c0_i32, %c0_i32_0 : i32, i32
  }
  func.func @transform_5(%arg0: i32, %arg1: i32) -> (i32, i32) {
    %c0_i32 = arith.constant 0 : i32
    %c0_i32_0 = arith.constant 0 : i32
    %c0_i32_1 = arith.constant 0 : i32
    return %c0_i32, %c0_i32_0 : i32, i32
  }
  func.func @transform_6(%arg0: i32, %arg1: i32) -> (i32, i32) {
    %c0_i32 = arith.constant 0 : i32
    %c0_i32_0 = arith.constant 0 : i32
    %c0_i32_1 = arith.constant 0 : i32
    return %c0_i32, %c0_i32_0 : i32, i32
  }
  func.func @transform_7(%arg0: i32, %arg1: i32) -> (i32, i32) {
    %c0_i32 = arith.constant 0 : i32
    %c0_i32_0 = arith.constant 0 : i32
    %c0_i32_1 = arith.constant 0 : i32
    return %c0_i32, %c0_i32_0 : i32, i32
  }
  func.func @transform_8(%arg0: i32, %arg1: i32) -> (i32, i32) {
    %c0_i32 = arith.constant 0 : i32
    %c0_i32_0 = arith.constant 0 : i32
    %c0_i32_1 = arith.constant 0 : i32
    return %c0_i32, %c0_i32_0 : i32, i32
  }
  func.func @transform_9(%arg0: i32, %arg1: i32) -> (i32, i32) {
    %c0_i32 = arith.constant 0 : i32
    %c0_i32_0 = arith.constant 0 : i32
    %c0_i32_1 = arith.constant 0 : i32
    return %c0_i32, %c0_i32_0 : i32, i32
  }
  func.func @transform_10(%arg0: i32, %arg1: i32) -> (i32, i32) {
    %c0_i32 = arith.constant 0 : i32
    %c0_i32_0 = arith.constant 0 : i32
    %c0_i32_1 = arith.constant 0 : i32
    return %c0_i32, %c0_i32_0 : i32, i32
  }
  func.func @transform_11(%arg0: i32, %arg1: i32) -> (i32, i32) {
    %c0_i32 = arith.constant 0 : i32
    %c0_i32_0 = arith.constant 0 : i32
    %c0_i32_1 = arith.constant 0 : i32
    return %c0_i32, %c0_i32_0 : i32, i32
  }
  func.func @transform_12(%arg0: i32, %arg1: i32) -> (i32, i32) {
    %c0_i32 = arith.constant 0 : i32
    %c0_i32_0 = arith.constant 0 : i32
    %c0_i32_1 = arith.constant 0 : i32
    return %c0_i32, %c0_i32_0 : i32, i32
  }
  func.func @transform_13(%arg0: i32, %arg1: i32) -> (i32, i32) {
    %c0_i32 = arith.constant 0 : i32
    %c0_i32_0 = arith.constant 0 : i32
    %c0_i32_1 = arith.constant 0 : i32
    return %c0_i32, %c0_i32_0 : i32, i32
  }
  func.func @transform_14(%arg0: i32, %arg1: i32) -> (i32, i32, i32) {
    %c0_i32 = arith.constant 0 : i32
    %c0_i32_0 = arith.constant 0 : i32
    return %arg0, %arg1, %c0_i32 : i32, i32, i32
  }
}

</mosaic_0001>

<bundles_post_ra>
// kernel: tpu_custom_call.1
= control target key start
LH: loop header
LB: loop body
LE: loop exit
PB: predicated region body
PF: predicated region fallthrough
CT: control target
= control target key end

     0   :  { %s3484_s0 = inlined_call_operand.vmem [shape: f32[2,16,32], index: 0, kind: input, shape index: {}]   ;;  %s3485_s1 = inlined_call_operand.vmem [shape: bf16[32,32], index: 1, kind: input, shape index: {}]   ;;  %s3486_s2 = inlined_call_operand.vmem [shape: bf16[32,32], index: 2, kind: input, shape index: {}]   ;;  %s3487_s3 = inlined_call_operand.vmem [shape: bf16[32,32], index: 3, kind: input, shape index: {}]   ;;  %s3488_s4 = inlined_call_operand.hbm [shape: bf16[32,32], index: 4, kind: input, shape index: {}]   ;;  %s3489_s5 = inlined_call_operand.vmem [shape: f32[1,32], index: 5, kind: input, shape index: {}]   ;;  %s3490_s6 = inlined_call_operand.vmem [shape: f32[1,32], index: 6, kind: input, shape index: {}]   ;;  %s3491_s7 = inlined_call_operand.vmem [shape: f32[1,32], index: 7, kind: input, shape index: {}]   ;;  %s3492_s8 = inlined_call_operand.vmem [shape: f32[1,32], index: 8, kind: input, shape index: {}]   ;;  %s3493_s9 = inlined_call_operand.vmem [shape: f32[1,32], index: 9, kind: input, shape index: {}]   ;;  %s3494_s10 = inlined_call_operand.hbm [shape: bf16[32,128], index: 10, kind: input, shape index: {}]   ;;  %s3495_s11 = inlined_call_operand.hbm [shape: f32[1,128], index: 11, kind: input, shape index: {}]   ;;  %s3496_s12 = inlined_call_operand.vmem [shape: bf16[128,32], index: 12, kind: input, shape index: {}]   ;;  %s3497_s13 = inlined_call_operand.vmem [shape: f32[1,32], index: 13, kind: input, shape index: {}]   ;;  %s3498_s14 = inlined_call_operand.hbm [shape: f32[2,16,32], index: 14, kind: output, shape index: {}]  }
   0x1   :  { %3512 = sst [smem:[#allocation25_spill]] %s3497_s13 }
   0x2   :  { %3513 = sst [smem:[#allocation26_spill]] %s3498_s14 }
   0x3   :  { %19 = vsyncpa [#allocation7], 0 }
   0x4   :  { %20 = vsyncpa [#allocation10], 0 }
   0x5   :  { %21 = vsyncpa [#allocation8], 0 }
   0x6   :  { %23 = vsyncpa [#allocation8 + $0x1], 0  ;;  %s2977_s29 = smov 0   ;;  %s2979_s30 = smov 0  }
   0x7   :  { %s2981_s15 = smov 0   ;;  %s2983_s16 = smov 0  }
   0x8   :  { %s2985_s17 = smov 0   ;;  %s2987_s18 = smov 0  }
   0x9   :  { %s2989_s19 = smov 0   ;;  %s2991_s20 = smov 0  }
   0xa LB: > { %3514 = sst [smem:[#allocation16_spill]] %s2752_s29  ;;  %s1889_s21 = sadd.s32 4294967295, %s2780_s20   ;;  %s2780_s20 = sphi %s2991_s20, %s29_s20   ;;  %s2776_s19 = sphi %s2989_s19, %s3561_s19   ;;  %s2772_s18 = sphi %s2987_s18, %s3560_s18   ;;  %s2768_s17 = sphi %s2985_s17, %s3559_s17   ;;  %s2764_s16 = sphi %s2983_s16, %s3558_s16   ;;  %s2760_s15 = sphi %s2981_s15, %s3557_s15   ;;  %s2756_s30 = sphi %s2979_s30, %s3563_s30   ;;  %s2752_s29 = sphi %s2977_s29, %s3562_s29  }
   0xb   : > { %3515 = sst [smem:[#allocation17_spill]] %s2760_s15  ;;  %s1890_s22 = sadd.s32 4294967294, %s2780_s20  }
   0xc   : > { %3516 = sst [smem:[#allocation18_spill]] %s2772_s18  ;;  %s38_s23 = sadd.s32 1, %s2772_s18 }
   0xd   : > { %3517 = sst [smem:[#allocation19_spill]] %s2776_s19  ;;  %s41_s24 = sadd.s32 1, %s2776_s19 }
   0xe   : > { %3518 = sst [smem:[#allocation20_spill]] %s2780_s20  ;;  %p39_p0 = scmp.ge.s32.totalorder %s38_s23, 2 }
   0xf   : > { %s349_s25 = sadd.s32 1, %s2760_s15  ;;  %p359_p1 = scmp.ne.s32.totalorder %s2760_s15, %s2756_s30 }
  0x10   : > { %p360_p2 = scmp.eq.s32.totalorder %s1889_s21, 3  ;;  %s3565_s23 = smov (%p39_p0, %s38_s23), 0 }
  0x11   : > { %3519 = sst [smem:[#allocation21_spill]] %s3565_s23  ;;  %s3567_s24 = smov (!%p39_p0, %s41_s24), %s2776_s19 }
  0x12   : > { %s345_s26 = ssub.s32 %s2772_s18, %s3565_s23  ;;  %p3029_p3 = por %p360_p2, %p359_p1 }
  0x13   : > { %p43_p4 = scmp.ge.s32.totalorder %s3567_s24, 2  ;;  %p365_p5 = scmp.ne.s32.totalorder %s2756_s30, %s2752_s29 }
  0x14   : > { %s3520_s27 = scalar_select %p3029_p3, 1, 0 }
  0x15   : > { %p366_p6 = scmp.eq.s32.totalorder %s1890_s22, 3  ;;  %p1891_p7 = scmp.ge.s32.totalorder %s2780_s20, 1 }
  0x16   : > { %s3569_s24 = smov (%p43_p4, %s3567_s24), 0  ;;  %p373_p9 = scmp.lt.s32.totalorder %s2780_s20, 5 }
  0x17   : > { %3521 = sst [smem:[#allocation22_spill]] %s3569_s24  ;;  %p3038_p8 = por %p366_p6, %p365_p5 }
  0x18   : > { %s344_s14 = ssub.s32 %s2776_s19, %s3569_s24  ;;  %p3045_p10 = pnand %p1891_p7, %p373_p9 }
  0x19   : > { %s3522_s28 = scalar_select %p3038_p8, 1, 0 }
  0x1a   : > { %s346_s13 = sor.u32 %s345_s26, %s344_s14  ;;  %p3049_p12 = scmp.eq.s32.totalorder %s1889_s21, 0 }
  0x1b   : > { %3523 = sst [smem:[#allocation23_spill]] %s3522_s28  ;;  %p347_p11 = scmp.eq.s32.totalorder %s346_s13, 0 }
  0x1c   : > { %s3525_s18 = scalar_select %p3049_p12, 1, 0 }
  0x1d   : > { %p2152_p13 = pneg %p3045_p10  ;;  %s2878_s14 = smov [#allocation9]  }
  0x1e   : > { %s3056_s22 = scalar_select %p347_p11, %s2760_s15, %s349_s25  }
  0x1f   : > { %p3060_p0 = pnand %p3049_p12, %p2152_p13  ;;  %s422_s26 = sshll.u32 %s2878_s14, 4  ;;  %s423_s26 = int_to_ptr.vmem [resolvable:$true] %s422_s26 }
  0x20   : > { %3526 = sst [smem:[#allocation24_spill]] %s3056_s22  ;;  %s2517_s13 = scalar_lea.vmem %s423_s26, 256 }
  0x21   : > { %p2508_p1 = pneg %p3060_p0  ;;  %p2518_p2 = scmp.ne.s32.totalorder %s423_s26, %s2517_s13 }
  0x22   : > { %p2525_p6 = scmp.lt.s32.totalorder %s423_s26, %s423_s26  ;;  %p2526_p7 = scmp.lt.s32.totalorder %s2517_s13, %s2517_s13 }
  0x23   : > { %p2520_p4 = pnand %p2518_p2, %p2508_p1 }
  0x24   : > { %p2527_p9 = por %p2526_p7, %p2525_p6 }
  0x25   : > { %p2521_p5 = pneg %p2520_p4 }
  0x27   : > { %p2528_p11 = pnand %p2527_p9, %p2521_p5 }
  0x29   : > { %2531 = shalt.err (!%p2528_p11)
}
  0x2a   : > { %s2879_s21 = smov 64   ;;  %s2880_s25 = smov 4  }
  0x2b   : > { %2158 = dma.hbm_to_vmem [thread:$0]  (!%p3060_p0), %s3494_s10, 256, %s423_s26, [#allocation10], %s2879_s21, %s2879_s21, %s2880_s25  }
  0x2c   : > { %s2881_s19 = smov [#allocation6]   ;;  %s2882_s15 = smov [#allocation11]  }
  0x2d   : > { %s394_s22 = sshll.u32 %s2881_s19, 4  ;;  %s436_s29 = sshll.u32 %s2882_s15, 4  ;;  %s395_s22 = int_to_ptr.vmem [resolvable:$true] %s394_s22  ;;  %s437_s29 = int_to_ptr.vmem [resolvable:$true] %s436_s29 }
  0x2e   : > { %s2543_s20 = scalar_lea.vmem %s395_s22, 256  ;;  %p2551_p5 = scmp.lt.s32.totalorder %s395_s22, %s395_s22 }
  0x2f   : > { %p2544_p13 = scmp.ne.s32.totalorder %s395_s22, %s2543_s20  ;;  %p2552_p6 = scmp.lt.s32.totalorder %s2543_s20, %s2543_s20 }
  0x31   : > { %p2546_p2 = pnand %p2544_p13, %p2508_p1  ;;  %p2553_p7 = por %p2552_p6, %p2551_p5 }
  0x33   : > { %p2547_p4 = pneg %p2546_p2 }
  0x35   : > { %p2554_p9 = pnand %p2553_p7, %p2547_p4 }
  0x37   : > { %2557 = shalt.err (!%p2554_p9)
}
  0x38   : > { %2155 = dma.hbm_to_vmem [thread:$0]  (!%p3060_p0), %s3488_s4, 256, %s395_s22, [#allocation7], %s2879_s21, %s2879_s21, %s2880_s25  }
  0x39   : > { %s2569_s15 = scalar_lea.vmem %s437_s29, 16  ;;  %s2576_s19 = scalar_lea.vmem %s437_s29, 32 }
  0x3a   : > { %p2570_p11 = scmp.ne.s32.totalorder %s437_s29, %s2569_s15  ;;  %p2577_p13 = scmp.lt.s32.totalorder %s437_s29, %s437_s29 }
  0x3b   : > { %p2578_p2 = scmp.lt.s32.totalorder %s2576_s19, %s2569_s15 }
  0x3c   : > { %p2572_p8 = pnand %p2570_p11, %p2508_p1 }
  0x3d   : > { %p2579_p12 = por %p2578_p2, %p2577_p13 }
  0x3e   : > { %p2573_p3 = pneg %p2572_p8 }
  0x40   : > { %p2580_p5 = pnand %p2579_p12, %p2573_p3 }
  0x42   : > { %2583 = shalt.err (!%p2580_p5)
}
  0x43   : > { %2161 = dma.hbm_to_vmem [thread:$0]  (!%p3060_p0), %s3495_s11, 16, %s437_s29, [#allocation10]  }
  0x44   : > { %463 = sbr.rel (%p3045_p10) target bundleno = 4771 (0x12a3), region = 76  ;;  %p3528_p4 = scmp.ne.s32.totalorder (!%p3045_p10), %s3525_s18, 0 }
  0x49   : > { %2739 = dma.done.wait (%p3528_p4), [#allocation7], 256  }
  0x4a   : > { %2741 = vsyncadd (%p3528_p4), [#allocation7], 4294967040 }
  0x4b   : > { %2743 = dma.done.wait (%p3528_p4), [#allocation10], 272  }
  0x4c   : > { %2745 = vsyncadd (%p3528_p4), [#allocation10], 4294967024  ;;  %s514_s29 = sand.u32 1, %s2756_s30   ;;  %p517_p3 = scmp.lt.s32.totalorder %s2768_s17, 1 }
  0x4d   : > { %s3104_s23 = sshll.u32 %s514_s29, 3  ;;  %s3107_s28 = sshll.u32 %s2764_s16, 3 }
  0x4e   : > { %s518_s22 = scalar_select %p517_p3, %s2768_s17, 1 }
  0x4f   : > { %s516_s24 = scalar_lea.vmem [#allocation12], %s3104_s23  ;;  %p1904_p8 = scmp.ne.s32.totalorder %s2764_s16, 0 }
  0x50   : > { %s1980_s21 = sshll.u32 %s518_s22, 4 }
  0x51   : > { %s3113_s18 = scalar_lea.vmem %s3484_s0, %s1980_s21  ;;  %527 = sbr.rel (%p1904_p8) target bundleno = 601 (0x259), region = 92 }
  0x56   : > { %v528_v0 = vld [vmem:[%s3113_s18] sm:$0xff]  ;;  %vm532_vm0 = vcmask 261120   ;;  %v529_v1 = vld [vmem:[%s3113_s18 + $0x8] sm:$0xff]  ;;  %v2883_v16 = vmov 0.0   ;;  %vm2884_vm1 = vmmov 0   ;;  %vm584_vm2 = vcmask 257024  }
  0x57   : > { %v533_v2 = vsel %vm532_vm0, %v528_v0, 0.0  ;;  %v536_v3 = vsel %vm532_vm0, %v529_v1, 0.0  ;;  %v2452_v14 = vld [vmem:[%s3486_s2 + $0x8] sm:$0xff]   ;;  %2030 = vmatprep.subr.bf16.mxu0 %v2883_v16  ;;  %2038 = vmatprep.subr.bf16.mxu1 %v2883_v16  ;;  %v2454_v17 = vld [vmem:[%s3486_s2] sm:$0xff]  }
  0x58   : > { %534 = vadd.xlane.f32.xlu0 %v533_v2  ;;  %v2453_v15 = vld [vmem:[%s3487_s3 + $0x8] sm:$0xff]   ;;  %2031 = vmatpush3.bf16.msra.mxu0 %v2452_v14  ;;  %v2455_v18 = vld [vmem:[%s3487_s3] sm:$0xff]  }
  0x59   : > { %2039 = vmatpush3.bf16.msra.mxu1 %v2453_v15  ;;  %2032 = vmatprep.subr.bf16.mxu0 %v2883_v16  ;;  %v1905_v26 = vld [vmem:[%s3490_s6] ss:$0 sm:$0xff] }
  0x5a   : > { %2040 = vmatprep.subr.bf16.mxu1 %v2883_v16  ;;  %2034 = vmatprep.mubr.msk.bf16.mxu0 %vm2884_vm1, %v2883_v16  ;;  %v1906_v28 = vld [vmem:[%s3491_s7] ss:$0 sm:$0xff] }
  0x5b   : > { %2042 = vmatprep.mubr.msk.bf16.mxu1 %vm2884_vm1, %v2883_v16 }
  0x5c   : > { %537 = vadd.xlane.f32.xlu0 %v536_v3  ;;  %2033 = vmatpush3.bf16.msra.mxu0 %v2454_v17 }
  0x5d   : > { %2041 = vmatpush3.bf16.msra.mxu1 %v2455_v18 }
  0xe1   : > { %v535_v4 = vpop.xlane.xlu0 %534 }
  0xe2   : > { %v540_v5 = vmul.f32 0.03125, %v535_v4 }
  0xe4   : > { %v542_v6 = vsub.f32 %v528_v0, %v540_v5 }
  0xe5   : > { %v538_v7 = vpop.xlane.xlu0 %537 }
  0xe6   : > { %v541_v8 = vmul.f32 0.03125, %v538_v7  ;;  %v544_v9 = vmul.f32 %v542_v6, %v542_v6 }
  0xe8   : > { %v543_v10 = vsub.f32 %v529_v1, %v541_v8  ;;  %v546_v11 = vsel %vm532_vm0, %v544_v9, 0.0 }
  0xe9   : > { %547 = vadd.xlane.f32.xlu1 %v546_v11 }
  0xea   : > { %v545_v12 = vmul.f32 %v543_v10, %v543_v10 }
  0xec   : > { %v549_v13 = vsel %vm532_vm0, %v545_v12, 0.0 }
  0xed   : > { %550 = vadd.xlane.f32.xlu1 %v549_v13 }
 0x172   : > { %v548_v19 = vpop.xlane.xlu1 %547 }
 0x173   : > { %v552_v20 = vmul.f32 0.03125, %v548_v19 }
 0x175   : > { %v554_v21 = vadd.f32 1e-05, %v552_v20 }
 0x176   : > { %v551_v22 = vpop.xlane.xlu1 %550 }
 0x177   : > { %2456 = vrsqrt.f32 %v554_v21  ;;  %v553_v23 = vmul.f32 0.03125, %v551_v22 }
 0x179   : > { %v555_v24 = vadd.f32 1e-05, %v553_v23 }
 0x17b   : > { %2458 = vrsqrt.f32 %v555_v24 }
 0x184   : > { %v2457_v25 = vpop.eup %2456 }
 0x185   : > { %v558_v27 = vmul.f32 %v2457_v25, %v542_v6 }
 0x187   : > { %v566_v29 = vmul.f32 %v1905_v26, %v558_v27 }
 0x188   : > { %v2459_v30 = vpop.eup %2458 }
 0x189   : > { %v559_v31 = vmul.f32 %v2459_v30, %v543_v10  ;;  %v574_v32 = vadd.f32 %v1906_v28, %v566_v29 }
 0x18b   : > { %v567_v33 = vmul.f32 %v1905_v26, %v559_v31  ;;  %v1981_v34 = vpack.c.bf16 %v574_v32, %v574_v32 }
 0x18d   : > { %v575_v35 = vadd.f32 %v1906_v28, %v567_v33  ;;  %585 = vst.msk [vmem:[#allocation2] sm:$0xf] %vm584_vm2, %v1981_v34 }
 0x18f   : > { %v576_v36 = vpack.c.bf16 %v575_v35, %v574_v32  ;;  %v1982_v37 = vpack.c.bf16 %v575_v35, %v575_v35 }
 0x191   : > { %2035 = vmatmul.mubr.msk.bf16.vlgmr.msra.gmra.mxu0 %vm532_vm0, %v576_v36  ;;  %2043 = vmatmul.mubr.msk.bf16.vlgmr.msra.gmra.mxu1 %vm532_vm0, %v576_v36  ;;  %586 = vst.msk [vmem:[#allocation2 + $0x4] sm:$0xf] %vm584_vm2, %v1982_v37 }
 0x251   : > { %v640_v38 = vpop.f32.mrf.mxu0  ;;  %v707_v39 = vpop.f32.mrf.mxu1 }
 0x252   : > { %v1983_v40 = vpack.c.bf16 %v640_v38, %v640_v38  ;;  %v1985_v41 = vpack.c.bf16 %v707_v39, %v707_v39 }
 0x253   : > { %v2036_v42 = vpop.f32.mrf.mxu0  ;;  %v2044_v43 = vpop.f32.mrf.mxu1 }
 0x254   : > { %655 = vst.msk [vmem:[#allocation3] sm:$0xf] %vm584_vm2, %v1983_v40  ;;  %722 = vst.msk [vmem:[#allocation4] sm:$0xf] %vm584_vm2, %v1985_v41 }
 0x255   : > { %v643_v44 = vpop.f32.mrf.mxu0  ;;  %v710_v45 = vpop.f32.mrf.mxu1 }
 0x256   : > { %v1984_v46 = vpack.c.bf16 %v643_v44, %v643_v44  ;;  %v1986_v47 = vpack.c.bf16 %v710_v45, %v710_v45 }
 0x257   : > { %v2037_v48 = vpop.f32.mrf.mxu0  ;;  %v2045_v49 = vpop.f32.mrf.mxu1 }
 0x258   : > { %656 = vst.msk [vmem:[#allocation3 + $0x4] sm:$0xf] %vm584_vm2, %v1984_v46  ;;  %723 = vst.msk [vmem:[#allocation4 + $0x4] sm:$0xf] %vm584_vm2, %v1986_v47 }
 0x259 PF: > { %s724_s20 = scalar_lea.vmem %s3113_s18, %s3107_s28  ;;  %v2460_v50 = vld [vmem:[%s3485_s1 + $0x8] sm:$0xff]   ;;  %v2885_v52 = vmov 0.0   ;;  %v2461_v53 = vld [vmem:[%s3485_s1] sm:$0xff]   ;;  %vm2886_vm3 = vmmov 0   ;;  %s726_s18 = sshra.s32 %s3107_s28, 3  ;;  %vm747_vm4 = vcmask 261120   ;;  %v793_v55 = vlaneseq }
 0x25a   : > { %v3154_v51 = vld [vmem:[%s724_s20] sm:$0xff]  ;;  %2046 = vmatprep.subr.bf16.mxu0 %v2885_v52  ;;  %2050 = vmatprep.mubr.msk.bf16.mxu0 %vm2886_vm3, %v2885_v52  ;;  %s1919_s14 = sshll.u32 %s726_s18, 2  ;;  %v795_v57 = vstv %s3107_s28  ;;  %s3171_s15 = sadd.s32 1, %s2764_s16  ;;  %v3176_v2 = vmov 0.0   ;;  %v3178_v3 = vmov 0.0  }
 0x25b   : > { %2047 = vmatpush3.bf16.msra.mxu0 %v2460_v50  ;;  %s729_s26 = scalar_lea.vmem [#allocation2], %s1919_s14  ;;  %v794_v56 = vshrl.u32 %v793_v55, 7  ;;  %v3168_v59 = vand.u32 127, %v793_v55  ;;  %p1923_p10 = scmp.le.s32.totalorder %s3171_s15, 0 }
 0x25c   : > { %2048 = vmatprep.subr.bf16.mxu0 %v2885_v52  ;;  %v730_v54 = vld [vmem:[%s729_s26] sm:$0xf]  ;;  %s3188_s28 = smov (!%p1923_p10), 0  }
 0x25d   : > { %v3166_v58 = vadd.s32 %v795_v57, %v794_v56 }
 0x25f   : > { %2049 = vmatpush3.bf16.msra.mxu0 %v2461_v53 }
 0x262   : > { %2051 = vmatmul.mubr.msk.bf16.vlgmr.msra.gmra.mxu0 %vm747_vm4, %v730_v54 }
 0x322   : > { %v785_v60 = vpop.f32.mrf.mxu0 }
 0x323   : > { %v791_v61 = vmul.f32 0.17677669, %v785_v60 }
 0x324   : > { %v2052_v62 = vpop.f32.mrf.mxu0  ;;  %1779 = sbr.rel (%p1923_p10) target bundleno = 1377 (0x561), region = 160 }
 0x325   : > { %v3173_v63 = vpack.c.bf16 %v791_v61, %v791_v61 }
 0x326   : > { %v788_v0 = vpop.f32.mrf.mxu0 }
 0x328   : > { %v2053_v1 = vpop.f32.mrf.mxu0 }
 0x329   : > { %v3182_v4 = vmov 0.0   ;;  %v3184_v5 = vmov 0.0   ;;  %v3186_v6 = vmov -1e+30  }
 0x32a LB: >> { %v2887_v7 = vmov 0.0   ;;  %vm2888_vm5 = vmmov 0   ;;  %s1924_s19 = sshll.u32 %s2796_s28, 3  ;;  %vm818_vm6 = vcmask 64512   ;;  %vm889_vm8 = vcmask 1043456   ;;  %s803_s28 = sadd.s32 1, %s2796_s28   ;;  %s2796_s28 = sphi %s3188_s28, %s803_s28   ;;  %v2792_v6 = vphi %v3186_v6, %v3531_v6   ;;  %v2788_v5 = vphi %v3184_v5, %v3530_v5   ;;  %v2784_v4 = vphi %v3182_v4, %v3529_v4  }
 0x32b   : >> { %2054 = vmatprep.subr.bf16.mxu0 %v2887_v7  ;;  %2056 = vmatprep.mubr.msk.bf16.mxu0 %vm2888_vm5, %v2887_v7  ;;  %s810_s20 = sshra.s32 %s1924_s19, 3  ;;  %v865_v10 = vstv %s1924_s19  ;;  %p802_p12 = scmp.ge.s32.totalorder %s803_s28, %s3171_s15 }
 0x32c   : >> { %2060 = vmatprep.subr.bf16.mxu1 %v2887_v7  ;;  %2062 = vmatprep.mubr.msk.bf16.mxu1 %vm2888_vm5, %v2887_v7  ;;  %s1925_s13 = sshll.u32 %s810_s20, 2  ;;  %v866_v11 = vadd.s32 %v865_v10, %v3168_v59 }
 0x32d   : >> { %s813_s22 = scalar_lea.vmem [#allocation3], %s1925_s13  ;;  %s816_s21 = scalar_lea.vmem [#allocation4], %s1925_s13 }
 0x32e   : >> { %v814_v8 = vld [vmem:[%s813_s22] sm:$0xf]  ;;  %vm867_vm7 = vcmp.ge.s32.totalorder %v3166_v58, %v866_v11 }
 0x32f   : >> { %v823_v9 = vsel %vm818_vm6, %v814_v8, 0  ;;  %v817_v18 = vld [vmem:[%s816_s21] sm:$0xf] }
 0x330   : >> { %2055 = vmatpush3.bf16.xpose.msra.mxu0 %v823_v9  ;;  %v891_v19 = vsel %vm889_vm8, %v817_v18, 0 }
 0x331   : >> { %2061 = vmatpush3.bf16.msra.mxu1 %v891_v19 }
 0x337   : >> { %2057 = vmatmul.mubr.msk.bf16.vlgmr.msra.gmra.mxu0 %vm818_vm6, %v3173_v63 }
 0x3f7   : >> { %v859_v12 = vpop.f32.mrf.mxu0 }
 0x3f8   : >> { %v868_v13 = vsel %vm867_vm7, %v859_v12, -1e+30 }
 0x3f9   : >> { %v2058_v14 = vpop.f32.mrf.mxu0  ;;  %v869_v15 = vsel %vm818_vm6, %v868_v13, -inf }
 0x3fa   : >> { %870 = vmax.xlane.f32.xlu0 %v869_v15 }
 0x3fb   : >> { %v862_v16 = vpop.f32.mrf.mxu0 }
 0x3fd   : >> { %v2059_v17 = vpop.f32.mrf.mxu0 }
 0x483   : >> { %v871_v20 = vpop.xlane.xlu0 %870 }
 0x484   : >> { %v872_v21 = vmax.f32 %v2792_v6, %v871_v20  }
 0x486   : >> { %v873_v22 = vsub.f32 %v2792_v6, %v872_v21  ;;  %v876_v23 = vsub.f32 %v868_v13, %v872_v21  ;;  %v3531_v6 = vmov %v872_v21 }
 0x488   : >> { %v877_v24 = vmul.f32 1.442695, %v876_v23  ;;  %v874_v28 = vmul.f32 1.442695, %v873_v22 }
 0x48a   : >> { %2462 = vpow2.f32 %v877_v24 }
 0x48b   : >> { %2464 = vpow2.f32 %v874_v28 }
 0x497   : >> { %v2463_v25 = vpop.eup %2462 }
 0x498   : >> { %v880_v26 = vsel %vm818_vm6, %v2463_v25, 0.0  ;;  %v885_v27 = vpack.c.bf16 %v2463_v25, %v2463_v25  ;;  %v2465_v29 = vpop.eup %2464 }
 0x499   : >> { %881 = vadd.xlane.f32.xlu0 %v880_v26  ;;  %v879_v30 = vmul.f32 %v2788_v5, %v2465_v29  ;;  %v884_v33 = vmul.f32 %v2784_v4, %v2465_v29 }
 0x49a   : >> { %2063 = vmatmul.mubr.msk.bf16.vlgmr.msra.gmra.mxu1 %vm818_vm6, %v885_v27 }
 0x522   : >> { %v882_v31 = vpop.xlane.xlu0 %881 }
 0x523   : >> { %v883_v32 = vadd.f32 %v882_v31, %v879_v30  }
 0x525   : >> { %v3530_v5 = vmov %v883_v32  ;;  %v3533_v3 = vmov (%p802_p12), %v883_v32 }
 0x55a   : >> { %v927_v34 = vpop.f32.mrf.mxu1 }
 0x55b   : >> { %v933_v35 = vadd.f32 %v927_v34, %v884_v33  }
 0x55c   : >> { %v2064_v36 = vpop.f32.mrf.mxu1  ;;  %805 = sbr.rel (!%p802_p12) target bundleno = 810 (0x32a), region = 166 }
 0x55d   : >> { %v3529_v4 = vmov %v933_v35  ;;  %v3532_v2 = vmov (%p802_p12), %v933_v35 }
 0x55e   : >> { %v930_v37 = vpop.f32.mrf.mxu1 }
 0x560   : >> { %v2065_v38 = vpop.f32.mrf.mxu1 }
 0x561 PF: > { %2466 = vrcp.f32 %v2804_v3  ;;  %vm937_vm9 = vcmask 60416   ;;  %v3221_v42 = vmov 0.0   ;;  %v3223_v43 = vmov 0.0   ;;  %s3233_s25 = smov (!%p1923_p10), 0   ;;  %v2804_v3 = vphi %v3178_v3, %v3533_v3   ;;  %v2800_v2 = vphi %v3176_v2, %v3532_v2  }
 0x56e   : > { %v2467_v39 = vpop.eup %2466 }
 0x56f   : > { %v935_v40 = vmul.f32 %v2800_v2, %v2467_v39  ;;  %1793 = sbr.rel (%p1923_p10) target bundleno = 2079 (0x81f), region = 171 }
 0x571   : > { %v936_v41 = vpack.c.bf16 %v935_v40, %v935_v40 }
 0x573   : > { %938 = vst.msk [vmem:[#allocation5] sm:$0xf] %vm937_vm9, %v936_v41 }
 0x574   : > { %v3227_v44 = vmov 0.0   ;;  %v3229_v45 = vmov 0.0   ;;  %v3231_v46 = vmov -1e+30  }
 0x575 LB: >> { %v2889_v47 = vmov 0.0   ;;  %vm2890_vm10 = vmmov 0   ;;  %s1930_s18 = sshll.u32 %s2820_s25, 3  ;;  %s2891_s20 = smov 120   ;;  %vm965_vm11 = vcmask 64512   ;;  %vm1041_vm13 = vcmask 1043456   ;;  %s2820_s25 = sphi %s3233_s25, %s942_s25   ;;  %v2816_v46 = vphi %v3231_v46, %v3536_v46   ;;  %v2812_v45 = vphi %v3229_v45, %v3535_v45   ;;  %v2808_v44 = vphi %v3227_v44, %v3534_v44  }
 0x576   : >> { %2066 = vmatprep.subr.bf16.mxu0 %v2889_v47  ;;  %2068 = vmatprep.mubr.msk.bf16.mxu0 %vm2890_vm10, %v2889_v47  ;;  %s949_s14 = sshra.s32 %s1930_s18, 3  ;;  %v1012_v54 = vstv %s1930_s18  ;;  %s942_s25 = sadd.s32 1, %s2820_s25  }
 0x577   : >> { %2072 = vmatprep.subr.bf16.mxu1 %v2889_v47  ;;  %2074 = vmatprep.mubr.msk.bf16.mxu1 %vm2890_vm10, %v2889_v47  ;;  %s1931_s26 = sshll.u32 %s949_s14, 2  ;;  %v1013_v55 = vadd.s32 %v1012_v54, %v3168_v59  ;;  %p941_p0 = scmp.ge.s32.totalorder %s942_s25, %s3171_s15 }
 0x578   : >> { %s952_s28 = scalar_lea.vmem [#allocation3], %s1931_s26  ;;  %s955_s19 = scalar_lea.vmem [#allocation4], %s1931_s26 }
 0x579   : >> { %v2468_v48 = vld [vmem:[%s952_s28] ss:$0 sps:$4 sm:$0xff]   ;;  %vm1014_vm12 = vcmp.ge.s32.totalorder %v3166_v58, %v1013_v55 }
 0x57a   : >> { %963 = vrot.lane.b32.xlu0 %v2468_v48, %s2891_s20  ;;  %v2469_v1 = vld [vmem:[%s955_s19] ss:$0 sps:$4 sm:$0xff]  }
 0x57e   : >> { %958 = vrot.lane.b32.xlu0 %v3173_v63, %s2891_s20 }
 0x5ec   : >> { %v964_v49 = vpop.permute.xlu0 %963 }
 0x5ed   : >> { %v970_v50 = vsel %vm965_vm11, %v964_v49, 0 }
 0x5ee   : >> { %2067 = vmatpush3.bf16.xpose.msra.mxu0 %v970_v50 }
 0x5f0   : >> { %v959_v53 = vpop.permute.xlu0 %958 }
 0x5f5   : >> { %2069 = vmatmul.mubr.msk.bf16.vlgmr.msra.gmra.mxu0 %vm965_vm11, %v959_v53 }
 0x6b5   : >> { %v1006_v56 = vpop.f32.mrf.mxu0 }
 0x6b6   : >> { %v1015_v57 = vsel %vm1014_vm12, %v1006_v56, -1e+30 }
 0x6b7   : >> { %v2070_v60 = vpop.f32.mrf.mxu0  ;;  %v1016_v61 = vsel %vm965_vm11, %v1015_v57, -inf }
 0x6b8   : >> { %1017 = vmax.xlane.f32.xlu1 %v1016_v61 }
 0x6b9   : >> { %v1009_v62 = vpop.f32.mrf.mxu0 }
 0x6bb   : >> { %v2071_v0 = vpop.f32.mrf.mxu0 }
 0x6c9   : >> { %1036 = vrot.lane.b32.xlu1 %v2469_v1, %s2891_s20 }
 0x741   : >> { %v1018_v2 = vpop.xlane.xlu1 %1017 }
 0x742   : >> { %v1019_v3 = vmax.f32 %v2816_v46, %v1018_v2  }
 0x744   : >> { %v1020_v4 = vsub.f32 %v2816_v46, %v1019_v3  ;;  %v1023_v5 = vsub.f32 %v1015_v57, %v1019_v3  ;;  %v3536_v46 = vmov %v1019_v3 }
 0x745   : >> { %v1037_v6 = vpop.permute.xlu1 %1036 }
 0x746   : >> { %v1024_v7 = vmul.f32 1.442695, %v1023_v5  ;;  %v1043_v8 = vsel %vm1041_vm13, %v1037_v6, 0  ;;  %v1021_v12 = vmul.f32 1.442695, %v1020_v4 }
 0x747   : >> { %2073 = vmatpush3.bf16.msra.mxu1 %v1043_v8 }
 0x748   : >> { %2470 = vpow2.f32 %v1024_v7 }
 0x749   : >> { %2472 = vpow2.f32 %v1021_v12 }
 0x755   : >> { %v2471_v9 = vpop.eup %2470 }
 0x756   : >> { %v1027_v10 = vsel %vm965_vm11, %v2471_v9, 0.0  ;;  %v1032_v11 = vpack.c.bf16 %v2471_v9, %v2471_v9  ;;  %v2473_v13 = vpop.eup %2472 }
 0x757   : >> { %1028 = vadd.xlane.f32.xlu0 %v1027_v10  ;;  %v1026_v14 = vmul.f32 %v2812_v45, %v2473_v13  ;;  %v1031_v17 = vmul.f32 %v2808_v44, %v2473_v13 }
 0x758   : >> { %2075 = vmatmul.mubr.msk.bf16.vlgmr.msra.gmra.mxu1 %vm965_vm11, %v1032_v11 }
 0x7e0   : >> { %v1029_v15 = vpop.xlane.xlu0 %1028 }
 0x7e1   : >> { %v1030_v16 = vadd.f32 %v1029_v15, %v1026_v14  }
 0x7e3   : >> { %v3535_v45 = vmov %v1030_v16  ;;  %v3538_v43 = vmov (%p941_p0), %v1030_v16 }
 0x818   : >> { %v1079_v18 = vpop.f32.mrf.mxu1 }
 0x819   : >> { %v1085_v19 = vadd.f32 %v1079_v18, %v1031_v17  }
 0x81a   : >> { %v2076_v20 = vpop.f32.mrf.mxu1  ;;  %944 = sbr.rel (!%p941_p0) target bundleno = 1397 (0x575), region = 177 }
 0x81b   : >> { %v3534_v44 = vmov %v1085_v19  ;;  %v3537_v42 = vmov (%p941_p0), %v1085_v19 }
 0x81c   : >> { %v1082_v21 = vpop.f32.mrf.mxu1 }
 0x81e   : >> { %v2077_v22 = vpop.f32.mrf.mxu1 }
 0x81f PF: > { %2474 = vrcp.f32 %v2828_v43  ;;  %s2892_s13 = smov 8   ;;  %vm1095_vm14 = vcmask 126016   ;;  %v3266_v27 = vmov 0.0   ;;  %v3268_v28 = vmov 0.0   ;;  %s3278_s22 = smov (!%p1923_p10), 0   ;;  %v2828_v43 = vphi %v3223_v43, %v3538_v43   ;;  %v2824_v42 = vphi %v3221_v42, %v3537_v42  }
 0x82c   : > { %v2475_v23 = vpop.eup %2474 }
 0x82d   : > { %v1087_v24 = vmul.f32 %v2824_v42, %v2475_v23 }
 0x82f   : > { %v1987_v25 = vpack.c.bf16 %v1087_v24, %v1087_v24 }
 0x831   : > { %1092 = vrot.lane.b32.xlu0 %v1987_v25, %s2892_s13 }
 0x8a0   : > { %1807 = sbr.rel (%p1923_p10) target bundleno = 2896 (0xb50), region = 182 }
 0x8a3   : > { %v1093_v26 = vpop.permute.xlu0 %1092 }
 0x8a4   : > { %1096 = vst.msk [vmem:[#allocation5] sm:$0xf] %vm1095_vm14, %v1093_v26 }
 0x8a5   : > { %v3272_v29 = vmov 0.0   ;;  %v3274_v30 = vmov 0.0   ;;  %v3276_v31 = vmov -1e+30  }
 0x8a6 LB: >> { %v2893_v32 = vmov 0.0   ;;  %vm2894_vm15 = vmmov 0   ;;  %s1939_s21 = sshll.u32 %s2844_s22, 3  ;;  %s2895_s28 = smov 112   ;;  %vm1123_vm0 = vcmask 64512   ;;  %vm1199_vm2 = vcmask 1043456   ;;  %s2844_s22 = sphi %s3278_s22, %s1100_s22   ;;  %v2840_v31 = vphi %v3276_v31, %v3541_v31   ;;  %v2836_v30 = vphi %v3274_v30, %v3540_v30   ;;  %v2832_v29 = vphi %v3272_v29, %v3539_v29  }
 0x8a7   : >> { %2078 = vmatprep.subr.bf16.mxu0 %v2893_v32  ;;  %2080 = vmatprep.mubr.msk.bf16.mxu0 %vm2894_vm15, %v2893_v32  ;;  %s1107_s25 = sshra.s32 %s1939_s21, 3  ;;  %v1170_v37 = vstv %s1939_s21  ;;  %s1100_s22 = sadd.s32 1, %s2844_s22  }
 0x8a8   : >> { %2084 = vmatprep.subr.bf16.mxu1 %v2893_v32  ;;  %2086 = vmatprep.mubr.msk.bf16.mxu1 %vm2894_vm15, %v2893_v32  ;;  %s1940_s18 = sshll.u32 %s1107_s25, 2  ;;  %v1171_v38 = vadd.s32 %v1170_v37, %v3168_v59  ;;  %p1099_p1 = scmp.ge.s32.totalorder %s1100_s22, %s3171_s15 }
 0x8a9   : >> { %s1110_s14 = scalar_lea.vmem [#allocation3], %s1940_s18  ;;  %s1113_s26 = scalar_lea.vmem [#allocation4], %s1940_s18 }
 0x8aa   : >> { %v2476_v33 = vld [vmem:[%s1110_s14] ss:$0 sps:$4 sm:$0xff]   ;;  %vm1172_vm1 = vcmp.ge.s32.totalorder %v3166_v58, %v1171_v38 }
 0x8ab   : >> { %1121 = vrot.lane.b32.xlu0 %v2476_v33, %s2895_s28  ;;  %v2477_v45 = vld [vmem:[%s1113_s26] ss:$0 sps:$4 sm:$0xff]  }
 0x8af   : >> { %1116 = vrot.lane.b32.xlu0 %v3173_v63, %s2895_s28 }
 0x91d   : >> { %v1122_v34 = vpop.permute.xlu0 %1121 }
 0x91e   : >> { %v1128_v35 = vsel %vm1123_vm0, %v1122_v34, 0 }
 0x91f   : >> { %2079 = vmatpush3.bf16.xpose.msra.mxu0 %v1128_v35 }
 0x921   : >> { %v1117_v36 = vpop.permute.xlu0 %1116 }
 0x926   : >> { %2081 = vmatmul.mubr.msk.bf16.vlgmr.msra.gmra.mxu0 %vm1123_vm0, %v1117_v36 }
 0x9e6   : >> { %v1164_v39 = vpop.f32.mrf.mxu0 }
 0x9e7   : >> { %v1173_v40 = vsel %vm1172_vm1, %v1164_v39, -1e+30 }
 0x9e8   : >> { %v2082_v41 = vpop.f32.mrf.mxu0  ;;  %v1174_v42 = vsel %vm1123_vm0, %v1173_v40, -inf }
 0x9e9   : >> { %1175 = vmax.xlane.f32.xlu1 %v1174_v42 }
 0x9ea   : >> { %v1167_v43 = vpop.f32.mrf.mxu0 }
 0x9ec   : >> { %v2083_v44 = vpop.f32.mrf.mxu0 }
 0x9fa   : >> { %1194 = vrot.lane.b32.xlu1 %v2477_v45, %s2895_s28 }
 0xa72   : >> { %v1176_v46 = vpop.xlane.xlu1 %1175 }
 0xa73   : >> { %v1177_v47 = vmax.f32 %v2840_v31, %v1176_v46  }
 0xa75   : >> { %v1178_v48 = vsub.f32 %v2840_v31, %v1177_v47  ;;  %v1181_v49 = vsub.f32 %v1173_v40, %v1177_v47  ;;  %v3541_v31 = vmov %v1177_v47 }
 0xa76   : >> { %v1195_v50 = vpop.permute.xlu1 %1194 }
 0xa77   : >> { %v1182_v53 = vmul.f32 1.442695, %v1181_v49  ;;  %v1201_v54 = vsel %vm1199_vm2, %v1195_v50, 0  ;;  %v1179_v60 = vmul.f32 1.442695, %v1178_v48 }
 0xa78   : >> { %2085 = vmatpush3.bf16.msra.mxu1 %v1201_v54 }
 0xa79   : >> { %2478 = vpow2.f32 %v1182_v53 }
 0xa7a   : >> { %2480 = vpow2.f32 %v1179_v60 }
 0xa86   : >> { %v2479_v55 = vpop.eup %2478 }
 0xa87   : >> { %v1185_v56 = vsel %vm1123_vm0, %v2479_v55, 0.0  ;;  %v1190_v57 = vpack.c.bf16 %v2479_v55, %v2479_v55  ;;  %v2481_v61 = vpop.eup %2480 }
 0xa88   : >> { %1186 = vadd.xlane.f32.xlu0 %v1185_v56  ;;  %v1184_v62 = vmul.f32 %v2836_v30, %v2481_v61  ;;  %v1189_v2 = vmul.f32 %v2832_v29, %v2481_v61 }
 0xa89   : >> { %2087 = vmatmul.mubr.msk.bf16.vlgmr.msra.gmra.mxu1 %vm1123_vm0, %v1190_v57 }
 0xb11   : >> { %v1187_v0 = vpop.xlane.xlu0 %1186 }
 0xb12   : >> { %v1188_v1 = vadd.f32 %v1187_v0, %v1184_v62  }
 0xb14   : >> { %v3540_v30 = vmov %v1188_v1  ;;  %v3543_v28 = vmov (%p1099_p1), %v1188_v1 }
 0xb49   : >> { %v1237_v3 = vpop.f32.mrf.mxu1 }
 0xb4a   : >> { %v1243_v4 = vadd.f32 %v1237_v3, %v1189_v2  }
 0xb4b   : >> { %v2088_v5 = vpop.f32.mrf.mxu1  ;;  %1102 = sbr.rel (!%p1099_p1) target bundleno = 2214 (0x8a6), region = 188 }
 0xb4c   : >> { %v3539_v29 = vmov %v1243_v4  ;;  %v3542_v27 = vmov (%p1099_p1), %v1243_v4 }
 0xb4d   : >> { %v1240_v6 = vpop.f32.mrf.mxu1 }
 0xb4f   : >> { %v2089_v7 = vpop.f32.mrf.mxu1 }
 0xb50 PF: > { %2482 = vrcp.f32 %v2852_v28  ;;  %s2896_s19 = smov 16   ;;  %vm1253_vm5 = vcmask 191616   ;;  %v3311_v12 = vmov 0.0   ;;  %v3313_v13 = vmov 0.0   ;;  %s3323_s20 = smov (!%p1923_p10), 0   ;;  %v2852_v28 = vphi %v3268_v28, %v3543_v28   ;;  %v2848_v27 = vphi %v3266_v27, %v3542_v27  }
 0xb5d   : > { %v2483_v8 = vpop.eup %2482 }
 0xb5e   : > { %v1245_v9 = vmul.f32 %v2848_v27, %v2483_v8 }
 0xb60   : > { %v1988_v10 = vpack.c.bf16 %v1245_v9, %v1245_v9 }
 0xb62   : > { %1250 = vrot.lane.b32.xlu0 %v1988_v10, %s2896_s19 }
 0xbd1   : > { %1821 = sbr.rel (%p1923_p10) target bundleno = 3713 (0xe81), region = 193 }
 0xbd4   : > { %v1251_v11 = vpop.permute.xlu0 %1250 }
 0xbd5   : > { %1254 = vst.msk [vmem:[#allocation5] sm:$0xf] %vm1253_vm5, %v1251_v11 }
 0xbd6   : > { %v3317_v14 = vmov 0.0   ;;  %v3319_v15 = vmov 0.0   ;;  %v3321_v16 = vmov -1e+30  }
 0xbd7 LB: >> { %v2897_v17 = vmov 0.0   ;;  %vm2898_vm6 = vmmov 0   ;;  %s1948_s13 = sshll.u32 %s2868_s20, 3  ;;  %s2899_s14 = smov 104   ;;  %vm1281_vm7 = vcmask 64512   ;;  %vm1357_vm9 = vcmask 1043456   ;;  %s2868_s20 = sphi %s3323_s20, %s1258_s20   ;;  %v2864_v16 = vphi %v3321_v16, %v3546_v16   ;;  %v2860_v15 = vphi %v3319_v15, %v3545_v15   ;;  %v2856_v14 = vphi %v3317_v14, %v3544_v14  }
 0xbd8   : >> { %2090 = vmatprep.subr.bf16.mxu0 %v2897_v17  ;;  %2092 = vmatprep.mubr.msk.bf16.mxu0 %vm2898_vm6, %v2897_v17  ;;  %s1265_s22 = sshra.s32 %s1948_s13, 3  ;;  %v1328_v22 = vstv %s1948_s13  ;;  %s1258_s20 = sadd.s32 1, %s2868_s20  }
 0xbd9   : >> { %2096 = vmatprep.subr.bf16.mxu1 %v2897_v17  ;;  %2098 = vmatprep.mubr.msk.bf16.mxu1 %vm2898_vm6, %v2897_v17  ;;  %s1949_s21 = sshll.u32 %s1265_s22, 2  ;;  %v1329_v23 = vadd.s32 %v1328_v22, %v3168_v59  ;;  %p1257_p6 = scmp.ge.s32.totalorder %s1258_s20, %s3171_s15 }
 0xbda   : >> { %s1268_s25 = scalar_lea.vmem [#allocation3], %s1949_s21  ;;  %s1271_s18 = scalar_lea.vmem [#allocation4], %s1949_s21 }
 0xbdb   : >> { %v2484_v18 = vld [vmem:[%s1268_s25] ss:$0 sps:$4 sm:$0xff]   ;;  %vm1330_vm8 = vcmp.ge.s32.totalorder %v3166_v58, %v1329_v23 }
 0xbdc   : >> { %1279 = vrot.lane.b32.xlu0 %v2484_v18, %s2899_s14  ;;  %v2485_v30 = vld [vmem:[%s1271_s18] ss:$0 sps:$4 sm:$0xff]  }
 0xbe0   : >> { %1274 = vrot.lane.b32.xlu0 %v3173_v63, %s2899_s14 }
 0xc4e   : >> { %v1280_v19 = vpop.permute.xlu0 %1279 }
 0xc4f   : >> { %v1286_v20 = vsel %vm1281_vm7, %v1280_v19, 0 }
 0xc50   : >> { %2091 = vmatpush3.bf16.xpose.msra.mxu0 %v1286_v20 }
 0xc52   : >> { %v1275_v21 = vpop.permute.xlu0 %1274 }
 0xc57   : >> { %2093 = vmatmul.mubr.msk.bf16.vlgmr.msra.gmra.mxu0 %vm1281_vm7, %v1275_v21 }
 0xd17   : >> { %v1322_v24 = vpop.f32.mrf.mxu0 }
 0xd18   : >> { %v1331_v25 = vsel %vm1330_vm8, %v1322_v24, -1e+30 }
 0xd19   : >> { %v2094_v26 = vpop.f32.mrf.mxu0  ;;  %v1332_v27 = vsel %vm1281_vm7, %v1331_v25, -inf }
 0xd1a   : >> { %1333 = vmax.xlane.f32.xlu1 %v1332_v27 }
 0xd1b   : >> { %v1325_v28 = vpop.f32.mrf.mxu0 }
 0xd1d   : >> { %v2095_v29 = vpop.f32.mrf.mxu0 }
 0xd2b   : >> { %1352 = vrot.lane.b32.xlu1 %v2485_v30, %s2899_s14 }
 0xda3   : >> { %v1334_v31 = vpop.xlane.xlu1 %1333 }
 0xda4   : >> { %v1335_v32 = vmax.f32 %v2864_v16, %v1334_v31  }
 0xda6   : >> { %v1336_v33 = vsub.f32 %v2864_v16, %v1335_v32  ;;  %v1339_v34 = vsub.f32 %v1331_v25, %v1335_v32  ;;  %v3546_v16 = vmov %v1335_v32 }
 0xda7   : >> { %v1353_v35 = vpop.permute.xlu1 %1352 }
 0xda8   : >> { %v1340_v36 = vmul.f32 1.442695, %v1339_v34  ;;  %v1359_v37 = vsel %vm1357_vm9, %v1353_v35, 0  ;;  %v1337_v41 = vmul.f32 1.442695, %v1336_v33 }
 0xda9   : >> { %2097 = vmatpush3.bf16.msra.mxu1 %v1359_v37 }
 0xdaa   : >> { %2486 = vpow2.f32 %v1340_v36 }
 0xdab   : >> { %2488 = vpow2.f32 %v1337_v41 }
 0xdb7   : >> { %v2487_v38 = vpop.eup %2486 }
 0xdb8   : >> { %v1343_v39 = vsel %vm1281_vm7, %v2487_v38, 0.0  ;;  %v1348_v40 = vpack.c.bf16 %v2487_v38, %v2487_v38  ;;  %v2489_v42 = vpop.eup %2488 }
 0xdb9   : >> { %1344 = vadd.xlane.f32.xlu0 %v1343_v39  ;;  %v1342_v43 = vmul.f32 %v2860_v15, %v2489_v42  ;;  %v1347_v46 = vmul.f32 %v2856_v14, %v2489_v42 }
 0xdba   : >> { %2099 = vmatmul.mubr.msk.bf16.vlgmr.msra.gmra.mxu1 %vm1281_vm7, %v1348_v40 }
 0xe42   : >> { %v1345_v44 = vpop.xlane.xlu0 %1344 }
 0xe43   : >> { %v1346_v45 = vadd.f32 %v1345_v44, %v1342_v43  }
 0xe45   : >> { %v3545_v15 = vmov %v1346_v45  ;;  %v3548_v13 = vmov (%p1257_p6), %v1346_v45 }
 0xe7a   : >> { %v1395_v47 = vpop.f32.mrf.mxu1 }
 0xe7b   : >> { %v1401_v48 = vadd.f32 %v1395_v47, %v1347_v46  }
 0xe7c   : >> { %v2100_v49 = vpop.f32.mrf.mxu1  ;;  %1260 = sbr.rel (!%p1257_p6) target bundleno = 3031 (0xbd7), region = 199 }
 0xe7d   : >> { %v3544_v14 = vmov %v1401_v48  ;;  %v3547_v12 = vmov (%p1257_p6), %v1401_v48 }
 0xe7e   : >> { %v1398_v50 = vpop.f32.mrf.mxu1 }
 0xe80   : >> { %v2101_v53 = vpop.f32.mrf.mxu1 }
 0xe81 PF: > { %2502 = vrcp.f32 %v2876_v13  ;;  %2102 = vmatprep.subr.bf16.mxu1 %v2885_v52  ;;  %2106 = vmatprep.mubr.msk.bf16.mxu1 %vm2886_vm3, %v2885_v52  ;;  %v2490_v58 = vld [vmem:[#allocation6 + $0x8] sm:$0xff]   ;;  %v2491_v59 = vld [vmem:[#allocation6] sm:$0xff]   ;;  %s2900_s15 = smov 24   ;;  %vm1411_vm10 = vcmask 257216   ;;  %v2492_v10 = vld [vmem:[#allocation9 + $0x8] sm:$0xff]   ;;  %s1976_s26 = sshll.u32 %s2768_s17, 1  ;;  %v2876_v13 = vphi %v3313_v13, %v3548_v13   ;;  %v2872_v12 = vphi %v3311_v12, %v3547_v12  }
 0xe82   : > { %2118 = vmatprep.subr.bf16.mxu0 %v2885_v52  ;;  %2134 = vmatprep.mubr.msk.bf16.mxu0 %vm2886_vm3, %v2885_v52  ;;  %v1959_v61 = vld [vmem:[%s3489_s5] ss:$0 sm:$0xff]  ;;  %v2494_v11 = vld [vmem:[%s3496_s12 + $0x38] sm:$0xff]   ;;  %v2496_v13 = vld [vmem:[%s3496_s12 + $0x28] sm:$0xff]   ;;  %s1706_s28 = sadd.s32 %s2764_s16, %s1976_s26  ;;  %s3549_s13 = sld [smem:[#allocation25_spill]] }
 0xe83   : > { %2103 = vmatpush3.bf16.msra.mxu1 %v2490_v58  ;;  %2119 = vmatpush3.bf16.msra.mxu0 %v2494_v11  ;;  %v2497_v14 = vld [vmem:[%s3496_s12 + $0x20] sm:$0xff]   ;;  %v2498_v15 = vld [vmem:[%s3496_s12 + $0x18] sm:$0xff]   ;;  %v2499_v16 = vld [vmem:[%s3496_s12 + $0x10] sm:$0xff]   ;;  %s1977_s22 = sshll.u32 %s1706_s28, 7  ;;  %s1710_s21 = sshll.u32 %s516_s24, 4  ;;  %s3429_s21 = int_to_ptr.vmem [resolvable:$true] %s1710_s21 }
 0xe84   : > { %2104 = vmatprep.subr.bf16.mxu1 %v2885_v52  ;;  %2120 = vmatprep.subr.bf16.mxu0 %v2885_v52  ;;  %v1960_v21 = vld [vmem:[%s3492_s8] ss:$0 sm:$0xff]  ;;  %v2500_v27 = vld [vmem:[%s3496_s12 + $0x8] sm:$0xff]   ;;  %v1962_v29 = vld [vmem:[#allocation11] ss:$0 sm:$0xff]  ;;  %s3550_s14 = sld [smem:[#allocation26_spill]] }
 0xe85   : > { %v1961_v23 = vld [vmem:[%s3493_s9] ss:$0 sm:$0xff]  ;;  %s1695_s16 = scalar_lea.sflag [#allocation8], %s514_s29  ;;  %s2584_s17 = scalar_lea.vmem %s3429_s21, 128 }
 0xe86   : > { %v2501_v28 = vld [vmem:[%s3496_s12] sm:$0xff]   ;;  %p2585_p7 = scmp.ne.s32.totalorder %s3429_s21, %s2584_s17  ;;  %p3551_p9 = scmp.ne.s32.totalorder %s3520_s27, 0 }
 0xe87   : > { %2105 = vmatpush3.bf16.msra.mxu1 %v2491_v59  ;;  %s2901_s26 = smov [#allocation12]  }
 0xe88   : > { %2110 = vmatprep.subr.bf16.mxu1 %v2885_v52  ;;  %p2586_p11 = pnand %p2585_p7, %p3551_p9  ;;  %s2588_s28 = sshll.u32 %s2901_s26, 4  ;;  %s2589_s28 = int_to_ptr.vmem [resolvable:$false] %s2588_s28 }
 0xe89   : > { %s2590_s19 = scalar_lea.vmem %s2589_s28, 256  ;;  %p2591_p2 = scmp.lt.s32.totalorder %s3429_s21, %s2589_s28 }
 0xe8a   : > { %p2587_p13 = pneg %p2586_p11  ;;  %p2592_p5 = scmp.lt.s32.totalorder %s2590_s19, %s2584_s17 }
 0xe8c   : > { %p2593_p4 = por %p2592_p5, %p2591_p2 }
 0xe8e   : > { %v2503_v63 = vpop.eup %2502  ;;  %p2594_p3 = pnand %p2593_p4, %p2587_p13 }
 0xe8f   : > { %v1403_v54 = vmul.f32 %v2872_v12, %v2503_v63  ;;  %v2495_v12 = vld [vmem:[%s3496_s12 + $0x30] sm:$0xff]  }
 0xe90   : > { %2121 = vmatpush3.bf16.msra.mxu0 %v2495_v12 }
 0xe91   : > { %v1989_v55 = vpack.c.bf16 %v1403_v54, %v1403_v54  ;;  %2122 = vmatprep.subr.bf16.mxu0 %v2885_v52 }
 0xe93   : > { %1408 = vrot.lane.b32.xlu0 %v1989_v55, %s2900_s15  ;;  %s3427_s15 = scalar_lea.hbm %s3550_s14, %s1977_s22 }
 0xe94   : > { %2123 = vmatpush3.bf16.msra.mxu0 %v2496_v13 }
 0xe95   : > { %2124 = vmatprep.subr.bf16.mxu0 %v2885_v52 }
 0xe98   : > { %2125 = vmatpush3.bf16.msra.mxu0 %v2497_v14 }
 0xe99   : > { %2126 = vmatprep.subr.bf16.mxu0 %v2885_v52 }
 0xe9c   : > { %2127 = vmatpush3.bf16.msra.mxu0 %v2498_v15 }
 0xe9d   : > { %2128 = vmatprep.subr.bf16.mxu0 %v2885_v52 }
 0xea0   : > { %2129 = vmatpush3.bf16.msra.mxu0 %v2499_v16 }
 0xea1   : > { %2130 = vmatprep.subr.bf16.mxu0 %v2885_v52 }
 0xea4   : > { %2131 = vmatpush3.bf16.msra.mxu0 %v2500_v27 }
 0xea5   : > { %2132 = vmatprep.subr.bf16.mxu0 %v2885_v52 }
 0xea8   : > { %2133 = vmatpush3.bf16.msra.mxu0 %v2501_v28 }
 0xf05   : > { %v1409_v56 = vpop.permute.xlu0 %1408 }
 0xf06   : > { %1412 = vst.msk [vmem:[#allocation5] sm:$0xf] %vm1411_vm10, %v1409_v56 }
 0xf0d   : > { %v1413_v57 = vld [vmem:[#allocation5] sm:$0xf] }
 0xf0e   : > { %2107 = vmatmul.mubr.msk.bf16.vlgmr.msra.gmra.mxu1 %vm747_vm4, %v1413_v57 }
 0xf0f   : > { %2114 = vmatprep.mubr.msk.bf16.mxu1 %vm2886_vm3, %v2885_v52  ;;  %2111 = vmatpush3.bf16.msra.mxu1 %v2492_v10 }
 0xf10   : > { %2112 = vmatprep.subr.bf16.mxu1 %v2885_v52  ;;  %v1966_v52 = vld [vmem:[%s3549_s13] ss:$0 sm:$0xff] }
 0xfce   : > { %v1467_v60 = vpop.f32.mrf.mxu1 }
 0xfcf   : > { %v1473_v62 = vadd.f32 %v1467_v60, %v3154_v51  ;;  %v2493_v51 = vld [vmem:[#allocation9] sm:$0xff]  }
 0xfd0   : > { %v2108_v0 = vpop.f32.mrf.mxu1  ;;  %2113 = vmatpush3.bf16.msra.mxu1 %v2493_v51 }
 0xfd1   : > { %v3371_v1 = vadd.f32 %v1959_v61, %v1473_v62 }
 0xfd2   : > { %v1470_v2 = vpop.f32.mrf.mxu1 }
 0xfd3   : > { %v1484_v3 = vsel %vm747_vm4, %v3371_v1, 0.0 }
 0xfd4   : > { %1485 = vadd.xlane.f32.xlu0 %v1484_v3  ;;  %v2109_v4 = vpop.f32.mrf.mxu1 }
0x105d   : > { %v1486_v5 = vpop.xlane.xlu0 %1485 }
0x105e   : > { %v1488_v6 = vmul.f32 0.03125, %v1486_v5 }
0x1060   : > { %v1489_v7 = vsub.f32 %v3371_v1, %v1488_v6 }
0x1062   : > { %v1490_v8 = vmul.f32 %v1489_v7, %v1489_v7 }
0x1064   : > { %v1491_v9 = vsel %vm747_vm4, %v1490_v8, 0.0 }
0x1065   : > { %1492 = vadd.xlane.f32.xlu1 %v1491_v9 }
0x10ee   : > { %v1493_v17 = vpop.xlane.xlu1 %1492 }
0x10ef   : > { %v1494_v18 = vmul.f32 0.03125, %v1493_v17 }
0x10f1   : > { %v1495_v19 = vadd.f32 1e-05, %v1494_v18 }
0x10f3   : > { %2504 = vrsqrt.f32 %v1495_v19 }
0x1100   : > { %v2505_v20 = vpop.eup %2504 }
0x1101   : > { %v1497_v22 = vmul.f32 %v2505_v20, %v1489_v7 }
0x1103   : > { %v1504_v24 = vmul.f32 %v1960_v21, %v1497_v22 }
0x1105   : > { %v1511_v25 = vadd.f32 %v1961_v23, %v1504_v24 }
0x1107   : > { %v1512_v26 = vpack.c.bf16 %v1511_v25, %v1511_v25 }
0x1109   : > { %2115 = vmatmul.mubr.msk.bf16.vlgmr.msra.gmra.mxu1 %vm747_vm4, %v1512_v26 }
0x11c9   : > { %v1573_v30 = vpop.f32.mrf.mxu1 }
0x11ca   : > { %v1574_v31 = vadd.f32 %v1962_v29, %v1573_v30 }
0x11cb   : > { %v2116_v32 = vpop.f32.mrf.mxu1 }
0x11cc   : > { %v1579_v33 = vmax.f32 %v1574_v31, 0.0 }
0x11cd   : > { %v1576_v34 = vpop.f32.mrf.mxu1 }
0x11ce   : > { %v1580_v35 = vpack.c.bf16 %v1579_v33, %v1579_v33 }
0x11cf   : > { %v2117_v36 = vpop.f32.mrf.mxu1 }
0x11d0   : > { %2135 = vmatmul.mubr.bf16.vlgmr.msra.gmra.mxu0 %v1580_v35 }
0x1290   : > { %v1686_v37 = vpop.f32.mrf.mxu0 }
0x1291   : > { %v1687_v38 = vadd.f32 %v1966_v52, %v1686_v37 }
0x1292   : > { %v2136_v39 = vpop.f32.mrf.mxu0 }
0x1293   : > { %v1692_v40 = vadd.f32 %v1687_v38, %v3371_v1 }
0x1294   : > { %v1689_v41 = vpop.f32.mrf.mxu0 }
0x1295   : > { %1693 = vst.msk [vmem:[%s516_s24] sm:$0xff] %vm747_vm4, %v1692_v40 }
0x1296   : > { %v2137_v42 = vpop.f32.mrf.mxu0 }
0x1297   : > { %2597 = shalt.err (!%p2594_p3)
}
0x1298   : > { %s2598_s23 = scalar_lea.hbm %s3427_s15, 128  ;;  %s2602_s20 = scalar_lea.hbm %s3550_s14, 512 }
0x1299   : > { %p2599_p8 = scmp.ne.s32.totalorder %s3427_s15, %s2598_s23  ;;  %p2603_p0 = scmp.lt.s32.totalorder %s3427_s15, %s3550_s14 }
0x129a   : > { %p2604_p1 = scmp.lt.s32.totalorder %s2602_s20, %s2598_s23 }
0x129b   : > { %p2600_p10 = pnand %p2599_p8, %p3551_p9 }
0x129c   : > { %p2605_p6 = por %p2604_p1, %p2603_p0 }
0x129d   : > { %p2601_p12 = pneg %p2600_p10 }
0x129f   : > { %p2606_p7 = pnand %p2605_p6, %p2601_p12 }
0x12a1   : > { %2609 = shalt.err (!%p2606_p7)
}
0x12a2   : > { %2150 = dma.vmem_to_hbm [thread:$0]  (%p3551_p9), %s3429_s21, 128, %s3427_s15, %s1695_s16  }
0x12a3 PF: > { %s3552_s25 = sld [smem:[#allocation20_spill]] }
0x12a4   : > { %s3553_s18 = sld [smem:[#allocation16_spill]] }
0x12a5   : > { %s3554_s17 = sld [smem:[#allocation23_spill]] }
0x12a9   : > { %p2172_p11 = scmp.ge.s32.totalorder %s3552_s25, 2 }
0x12aa   : > { %s1722_s26 = sand.u32 1, %s3553_s18  }
0x12ab   : > { %p3555_p13 = scmp.ne.s32.totalorder %s3554_s17, 0  ;;  %s1723_s28 = scalar_lea.sflag [#allocation8], %s1722_s26 }
0x12ad   : > { %p2163_p2 = pnand %p2172_p11, %p3555_p13 }
0x12af   : > { %p2164_p5 = pneg %p2163_p2 }
0x12b1   : > { %2747 = dma.done.wait (%p2164_p5), %s1723_s28, 128  }
0x12b2   : > { %2749 = vsyncadd (%p2164_p5), %s1723_s28, 4294967168  ;;  %s29_s20 = sadd.s32 1, %s3552_s25   ;;  %s3556_s27 = sld [smem:[#allocation17_spill]] }
0x12b3   : > { %p26_p4 = scmp.ge.s32.totalorder %s29_s20, 6   ;;  %s3557_s15 = sld [smem:[#allocation24_spill]] }
0x12b4   : > { %s3558_s16 = sld [smem:[#allocation18_spill]]  ;;  %s3562_s29 = smov %s2756_s30 }
0x12b5   : > { %s3559_s17 = sld [smem:[#allocation19_spill]]  ;;  %28 = sbr.rel (!%p26_p4) target bundleno = 10 (0xa), region = 210 }
0x12b6   : > { %s3560_s18 = sld [smem:[#allocation21_spill]] }
0x12b7   : > { %s3561_s19 = sld [smem:[#allocation22_spill]] }
0x12b8   : > { %s3563_s30 = smov %s3556_s27 }
0x12ba   :  { %1728 = vsyncpa [#allocation7], 1 }
0x12bb   :  { %1730 = vsyncpa [#allocation7 + $0x1], 1 }
0x12bc   :  { %1731 = vsyncpa [#allocation10], 1 }
0x12bd   :  { %1732 = vsyncpa [#allocation8], 1 }
0x12be   :  { %1734 = vsyncpa [#allocation8 + $0x1], 1 }

</bundles_post_ra>
